<compile_context>
chip_gen: v7x
topology: tpu7x:2x2x1
jax: 0.10.0
libtpu: 0.0.40
codegen_flags: <defaults>
</compile_context>

<pallas_src>
import math

import jax
import jax.numpy as jnp
from jax import lax
from jax.experimental import pallas as pl
from jax.experimental.pallas import tpu as pltpu

# ---------------- small BERT-like config (synthetic, deterministic init) ----
VOCAB = 64
HIDDEN = 32
N_HEADS = 4
HEAD_DIM = HIDDEN // N_HEADS
INTERMEDIATE = 64
N_LAYERS = 2
MAX_POS = 16
TYPE_VOCAB = 2
N_CLASSES = 6
LN_EPS = 1e-12
CLS_PAD = 128          # lane-dense padded width for the classifier output
W3 = 3 * HIDDEN        # packed-slab lane width (96)


# ---------------- in-kernel helpers (value-level) ----------------------------
def _layernorm(x, g, b):
    mean = jnp.mean(x, axis=-1, keepdims=True)
    var = jnp.mean(jnp.square(x - mean), axis=-1, keepdims=True)
    return (x - mean) * lax.rsqrt(var + LN_EPS) * g + b


def _gelu(x):
    # TODO(synk): HF BERT uses exact (erf) GELU; tanh approximation used here
    # for Mosaic-safe lowering (numerically very close).
    c = math.sqrt(2.0 / math.pi)
    return 0.5 * x * (1.0 + jnp.tanh(c * (x + 0.044715 * x * x * x)))


# ---------------- the fused kernel -------------------------------------------
def _fused_bert_kernel(onehot_ref,      # (B*S, VOCAB) f32 one-hot token ids
                       pos_type_ref,    # (B*S, H) f32 pos + token-type(0) emb
                       attn_bias_ref,   # (B*S, B*S) f32 additive attn mask
                       emb_tab_ref,     # (VOCAB+2+H+1, H): word_emb | ln_g |
                                        #   ln_b | pooler_w | pooler_b
                       cls_tab_ref,     # (H+1, 128): cls_w_pad | cls_b_pad
                       w_ref,           # (L, 5H, 3H): qkv_w | ao_w | ff1_w | ff2_w
                       b_ref,           # (L, 8, 3H): biases + LN params
                       out_ref):        # (B*S, 128)
    f32 = jnp.float32
    BS = onehot_ref.shape[0]
    scale = 1.0 / math.sqrt(HEAD_DIM)

    # ---- embeddings: one MXU one-hot matmul + one vector add ---------------
    word_emb = emb_tab_ref[0:VOCAB, :]                         # (VOCAB, H)
    x = (jnp.dot(onehot_ref[...], word_emb, preferred_element_type=f32)
         + pos_type_ref[...])                                  # (BS, H)
    x = _layernorm(x,
                   emb_tab_ref[VOCAB:VOCAB + 1, :],
                   emb_tab_ref[VOCAB + 1:VOCAB + 2, :])

    attn_bias = attn_bias_ref[...]                             # (BS, BS)

    # ---- encoder layers (fully unrolled, everything stays on-chip) ---------
    for l in range(N_LAYERS):
        w = w_ref[l]                                           # (5H, 3H)
        qkv_w = w[0 * HIDDEN:1 * HIDDEN, :]                    # (H, 3H)
        ao_w = w[1 * HIDDEN:2 * HIDDEN, 0:HIDDEN]              # (H, H)
        ff1_w = w[2 * HIDDEN:3 * HIDDEN, 0:INTERMEDIATE]       # (H, I)
        ff2_w = w[3 * HIDDEN:3 * HIDDEN + INTERMEDIATE, 0:HIDDEN]   # (I, H)

        b = b_ref[l]                                           # (8, 3H)
        qkv_b = b[0:1, :]                                      # (1, 3H)
        ao_b = b[1:2, 0:HIDDEN]
        ff1_b = b[2:3, 0:INTERMEDIATE]
        ff2_b = b[3:4, 0:HIDDEN]
        ln1_g = b[4:5, 0:HIDDEN]
        ln1_b = b[5:6, 0:HIDDEN]
        ln2_g = b[6:7, 0:HIDDEN]
        ln2_b = b[7:8, 0:HIDDEN]

        qkv = jnp.dot(x, qkv_w, preferred_element_type=f32) + qkv_b  # (BS, 3H)
        q = qkv[:, 0 * HIDDEN:1 * HIDDEN]
        k = qkv[:, 1 * HIDDEN:2 * HIDDEN]
        v = qkv[:, 2 * HIDDEN:3 * HIDDEN]

        # Attention batched over batch via block-diag additive mask; per-head
        # context folded straight into the attn-output projection (no concat).
        attn = jnp.zeros((BS, HIDDEN), f32)
        for h in range(N_HEADS):
            cols = slice(h * HEAD_DIM, (h + 1) * HEAD_DIM)
            qh, kh, vh = q[:, cols], k[:, cols], v[:, cols]    # (BS, dh)
            sc = lax.dot_general(qh, kh, (((1,), (1,)), ((), ())),
                                 preferred_element_type=f32)   # (BS, BS)
            sc = sc * scale + attn_bias
            sc = sc - jnp.max(sc, axis=-1, keepdims=True)
            p = jnp.exp(sc)
            p = p * pl.reciprocal(jnp.sum(p, axis=-1, keepdims=True),
                                  approx=True)
            ctx_h = jnp.dot(p, vh, preferred_element_type=f32)  # (BS, dh)
            attn = attn + jnp.dot(ctx_h, ao_w[cols, :],
                                  preferred_element_type=f32)   # (BS, H)

        x = _layernorm(attn + ao_b + x, ln1_g, ln1_b)

        hmid = _gelu(jnp.dot(x, ff1_w, preferred_element_type=f32) + ff1_b)
        ffo = jnp.dot(hmid, ff2_w, preferred_element_type=f32) + ff2_b
        x = _layernorm(ffo + x, ln2_g, ln2_b)

    # ---- pooler + classifier over ALL rows (CLS rows sliced outside) -------
    pooler_w = emb_tab_ref[VOCAB + 2:VOCAB + 2 + HIDDEN, :]    # (H, H)
    pooler_b = emb_tab_ref[VOCAB + 2 + HIDDEN:VOCAB + 3 + HIDDEN, :]  # (1, H)
    pooled = jnp.tanh(jnp.dot(x, pooler_w, preferred_element_type=f32)
                      + pooler_b)                              # (BS, H)
    # TODO(synk): dropout(0.1) on the pooled output is identity in eval mode.
    cls_w = cls_tab_ref[0:HIDDEN, :]                           # (H, 128)
    cls_b = cls_tab_ref[HIDDEN:HIDDEN + 1, :]                  # (1, 128)
    out_ref[...] = (jnp.dot(pooled, cls_w, preferred_element_type=f32)
                    + cls_b).astype(out_ref.dtype)


# ---------------- wrapper -----------------------------------------------------
def bert_emotion_forward(params, input_ids, attention_mask):
    B, S = input_ids.shape
    assert S <= MAX_POS
    BS = B * S
    f32 = jnp.float32

    # one-hot token ids (one MXU matmul inside the kernel replaces the gather)
    onehot = jax.nn.one_hot(input_ids.reshape(-1), VOCAB, dtype=f32)  # (BS, V)

    # constant position + token-type(=0) embedding slab
    pos_type = (jnp.tile(params["pos_emb"][:S], (B, 1))
                + params["type_emb"][0][None, :]).astype(f32)          # (BS, H)

    # full additive attention mask: batch block-diagonal + key-padding mask
    flat_batch = jnp.arange(BS) // S
    same_batch = flat_batch[:, None] == flat_batch[None, :]
    key_valid = (attention_mask.reshape(-1).astype(f32) > 0.0)[None, :]
    attn_bias = jnp.where(same_batch & key_valid, 0.0, -1e9).astype(f32)

    # packed embedding / pooler table: (VOCAB + 2 + H + 1, H)
    emb_tab = jnp.concatenate([
        params["word_emb"],
        params["emb_ln_g"][None, :],
        params["emb_ln_b"][None, :],
        params["pooler_w"],
        params["pooler_b"][None, :],
    ], axis=0).astype(f32)

    # lane-dense padded classifier table: (H + 1, 128)
    cls_w_pad = jnp.zeros((HIDDEN, CLS_PAD), f32).at[:, :N_CLASSES].set(
        params["cls_w"].astype(f32))
    cls_b_pad = jnp.zeros((1, CLS_PAD), f32).at[:, :N_CLASSES].set(
        params["cls_b"].astype(f32))
    cls_tab = jnp.concatenate([cls_w_pad, cls_b_pad], axis=0)

    # per-layer packed slabs
    def pad_cols(a, w):
        return jnp.zeros((a.shape[0], w), f32).at[:, :a.shape[1]].set(a)

    w_rows, b_rows = [], []
    for L in params["layers"]:
        qkv_w = jnp.concatenate([L["q_w"], L["k_w"], L["v_w"]], axis=1)  # (H,3H)
        w_rows.append(jnp.concatenate([
            qkv_w,
            pad_cols(L["ao_w"], W3),
            pad_cols(L["ff1_w"], W3),
            pad_cols(L["ff2_w"], W3),
        ], axis=0))                                            # (5H, 3H)
        qkv_b = jnp.concatenate([L["q_b"], L["k_b"], L["v_b"]])
        row = lambda v: pad_cols(v[None, :], W3)
        b_rows.append(jnp.concatenate([
            row(qkv_b), row(L["ao_b"]), row(L["ff1_b"]), row(L["ff2_b"]),
            row(L["ln1_g"]), row(L["ln1_b"]), row(L["ln2_g"]), row(L["ln2_b"]),
        ], axis=0))                                            # (8, 3H)
    w_slab = jnp.stack(w_rows)                                 # (L, 5H, 3H)
    b_slab = jnp.stack(b_rows)                                 # (L, 8, 3H)

    operands = (onehot, pos_type, attn_bias, emb_tab, cls_tab, w_slab, b_slab)

    in_specs = [pl.BlockSpec(op.shape, lambda i, _z=(0,) * op.ndim: _z)
                for op in operands]

    logits_pad = pl.pallas_call(
        _fused_bert_kernel,
        out_shape=jax.ShapeDtypeStruct((BS, CLS_PAD), f32),
        grid=(1,),
        in_specs=in_specs,
        out_specs=pl.BlockSpec((BS, CLS_PAD), lambda i: (0, 0)),
        compiler_params=pltpu.CompilerParams(
            dimension_semantics=("arbitrary",)),
    )(*operands)

    # CLS rows (position 0 of each sequence), first N_CLASSES lanes
    return logits_pad[0::S, :N_CLASSES]


# ---------------- parameters (deterministic synthetic init) ------------------
def init_params(key):
    def nrm(k, shape):
        return 0.02 * jax.random.normal(k, shape, jnp.float32)

    keys = jax.random.split(key, 8 + N_LAYERS)
    params = {
        "word_emb": nrm(keys[0], (VOCAB, HIDDEN)),
        "pos_emb": nrm(keys[1], (MAX_POS, HIDDEN)),
        "type_emb": nrm(keys[2], (TYPE_VOCAB, HIDDEN)),
        "emb_ln_g": jnp.ones((HIDDEN,), jnp.float32),
        "emb_ln_b": jnp.zeros((HIDDEN,), jnp.float32),
        "pooler_w": nrm(keys[3], (HIDDEN, HIDDEN)),
        "pooler_b": jnp.zeros((HIDDEN,), jnp.float32),
        "cls_w": nrm(keys[4], (HIDDEN, N_CLASSES)),     # nn.Linear(hidden, 6)
        "cls_b": jnp.zeros((N_CLASSES,), jnp.float32),
        "layers": [],
    }
    for l in range(N_LAYERS):
        lk = jax.random.split(keys[8 + l], 6)
        params["layers"].append({
            "q_w": nrm(lk[0], (HIDDEN, HIDDEN)), "q_b": jnp.zeros((HIDDEN,), jnp.float32),
            "k_w": nrm(lk[1], (HIDDEN, HIDDEN)), "k_b": jnp.zeros((HIDDEN,), jnp.float32),
            "v_w": nrm(lk[2], (HIDDEN, HIDDEN)), "v_b": jnp.zeros((HIDDEN,), jnp.float32),
            "ao_w": nrm(lk[3], (HIDDEN, HIDDEN)), "ao_b": jnp.zeros((HIDDEN,), jnp.float32),
            "ln1_g": jnp.ones((HIDDEN,), jnp.float32), "ln1_b": jnp.zeros((HIDDEN,), jnp.float32),
            "ff1_w": nrm(lk[4], (HIDDEN, INTERMEDIATE)), "ff1_b": jnp.zeros((INTERMEDIATE,), jnp.float32),
            "ff2_w": nrm(lk[5], (INTERMEDIATE, HIDDEN)), "ff2_b": jnp.zeros((HIDDEN,), jnp.float32),
            "ln2_g": jnp.ones((HIDDEN,), jnp.float32), "ln2_b": jnp.zeros((HIDDEN,), jnp.float32),
        })
    return params


# ---------------- main --------------------------------------------------------
if __name__ == "__main__":
    key = jax.random.PRNGKey(0)
    pkey, ikey = jax.random.split(key)
    params = init_params(pkey)

    B, S = 2, 8
    input_ids = jax.random.randint(ikey, (B, S), 0, VOCAB, dtype=jnp.int32)
    attention_mask = jnp.ones((B, S), jnp.float32)

    logits = jax.jit(bert_emotion_forward)(params, input_ids, attention_mask)
    jax.block_until_ready(logits)
    assert logits.shape == (B, N_CLASSES)
    assert logits.dtype == jnp.float32
    print("KERNEL_OK")
</pallas_src>

<mosaic_0001>
module attributes {stable_mosaic.version = 11 : i64} {
  func.func @_fused_bert_kernel(%arg0: i32, %arg1: memref<16x64xf32, #tpu.memory_space<vmem>>, %arg2: memref<16x32xf32, #tpu.memory_space<vmem>>, %arg3: memref<16x16xf32, #tpu.memory_space<vmem>>, %arg4: memref<99x32xf32, #tpu.memory_space<vmem>>, %arg5: memref<33x128xf32, #tpu.memory_space<vmem>>, %arg6: memref<2x160x96xf32, #tpu.memory_space<vmem>>, %arg7: memref<2x8x96xf32, #tpu.memory_space<vmem>>, %arg8: memref<16x128xf32, #tpu.memory_space<vmem>>) attributes {dimension_semantics = [#tpu.dimension_semantics<arbitrary>], iteration_bounds = array<i64: 1>, scalar_prefetch = 0 : i64, scratch_operands = 0 : i64, tpu.core_type = #tpu.core_type<tc>, window_params = [{pipeline_mode = #tpu.pipeline_mode<synchronous>, transform_indices = @transform_0, window_bounds = array<i64: 16, 64>}, {pipeline_mode = #tpu.pipeline_mode<synchronous>, transform_indices = @transform_1, window_bounds = array<i64: 16, 32>}, {pipeline_mode = #tpu.pipeline_mode<synchronous>, transform_indices = @transform_2, window_bounds = array<i64: 16, 16>}, {pipeline_mode = #tpu.pipeline_mode<synchronous>, transform_indices = @transform_3, window_bounds = array<i64: 99, 32>}, {pipeline_mode = #tpu.pipeline_mode<synchronous>, transform_indices = @transform_4, window_bounds = array<i64: 33, 128>}, {pipeline_mode = #tpu.pipeline_mode<synchronous>, transform_indices = @transform_5, window_bounds = array<i64: 2, 160, 96>}, {pipeline_mode = #tpu.pipeline_mode<synchronous>, transform_indices = @transform_6, window_bounds = array<i64: 2, 8, 96>}, {pipeline_mode = #tpu.pipeline_mode<synchronous>, transform_indices = @transform_7, window_bounds = array<i64: 16, 128>}]} {
    %c0 = arith.constant 0 : index
    %c0_0 = arith.constant 0 : index
    %0 = vector.load %arg4[%c0, %c0_0] : memref<99x32xf32, #tpu.memory_space<vmem>>, vector<64x32xf32>
    %c0_1 = arith.constant 0 : index
    %c0_2 = arith.constant 0 : index
    %1 = vector.load %arg1[%c0_1, %c0_2] : memref<16x64xf32, #tpu.memory_space<vmem>>, vector<16x64xf32>
    %cst = arith.constant dense<0.000000e+00> : vector<16x32xf32>
    %2 = tpu.matmul %1, %0, %cst {dimension_numbers = #tpu.dot_dimension_numbers<[1], [0], [0], [1], [0, 0, 1, 1], [], []>} : vector<16x64xf32>, vector<64x32xf32>, vector<16x32xf32> -> vector<16x32xf32>
    %c0_3 = arith.constant 0 : index
    %c0_4 = arith.constant 0 : index
    %3 = vector.load %arg2[%c0_3, %c0_4] : memref<16x32xf32, #tpu.memory_space<vmem>>, vector<16x32xf32>
    %4 = arith.addf %2, %3 : vector<16x32xf32>
    %c64 = arith.constant 64 : index
    %c0_5 = arith.constant 0 : index
    %5 = vector.load %arg4[%c64, %c0_5] : memref<99x32xf32, #tpu.memory_space<vmem>>, vector<1x32xf32>
    %c65 = arith.constant 65 : index
    %c0_6 = arith.constant 0 : index
    %6 = vector.load %arg4[%c65, %c0_6] : memref<99x32xf32, #tpu.memory_space<vmem>>, vector<1x32xf32>
    %cst_7 = arith.constant dense<0.000000e+00> : vector<16xf32>
    %7 = vector.multi_reduction <add>, %4, %cst_7 [1] : vector<16x32xf32> to vector<16xf32>
    %8 = vector.shape_cast %7 : vector<16xf32> to vector<16x1xf32>
    %cst_8 = arith.constant 3.200000e+01 : f32
    %9 = vector.broadcast %cst_8 : f32 to vector<16x1xf32>
    %10 = arith.divf %8, %9 : vector<16x1xf32>
    %11 = vector.broadcast %10 : vector<16x1xf32> to vector<16x32xf32>
    %12 = arith.subf %4, %11 : vector<16x32xf32>
    %13 = arith.mulf %12, %12 : vector<16x32xf32>
    %cst_9 = arith.constant dense<0.000000e+00> : vector<16xf32>
    %14 = vector.multi_reduction <add>, %13, %cst_9 [1] : vector<16x32xf32> to vector<16xf32>
    %15 = vector.shape_cast %14 : vector<16xf32> to vector<16x1xf32>
    %cst_10 = arith.constant 3.200000e+01 : f32
    %16 = vector.broadcast %cst_10 : f32 to vector<16x1xf32>
    %17 = arith.divf %15, %16 : vector<16x1xf32>
    %18 = vector.broadcast %10 : vector<16x1xf32> to vector<16x32xf32>
    %19 = arith.subf %4, %18 : vector<16x32xf32>
    %cst_11 = arith.constant 9.99999996E-13 : f32
    %20 = vector.broadcast %cst_11 : f32 to vector<16x1xf32>
    %21 = arith.addf %17, %20 : vector<16x1xf32>
    %22 = math.rsqrt %21 : vector<16x1xf32>
    %23 = vector.broadcast %22 : vector<16x1xf32> to vector<16x32xf32>
    %24 = arith.mulf %19, %23 : vector<16x32xf32>
    %25 = vector.broadcast %5 : vector<1x32xf32> to vector<16x32xf32>
    %26 = arith.mulf %24, %25 : vector<16x32xf32>
    %27 = vector.broadcast %6 : vector<1x32xf32> to vector<16x32xf32>
    %28 = arith.addf %26, %27 : vector<16x32xf32>
    %c0_12 = arith.constant 0 : index
    %c0_13 = arith.constant 0 : index
    %29 = vector.load %arg3[%c0_12, %c0_13] : memref<16x16xf32, #tpu.memory_space<vmem>>, vector<16x16xf32>
    %c0_14 = arith.constant 0 : index
    %c0_15 = arith.constant 0 : index
    %c0_16 = arith.constant 0 : index
    %30 = vector.load %arg6[%c0_14, %c0_15, %c0_16] : memref<2x160x96xf32, #tpu.memory_space<vmem>>, vector<1x160x96xf32>
    %31 = vector.shape_cast %30 : vector<1x160x96xf32> to vector<160x96xf32>
    %32 = vector.extract_strided_slice %31 {offsets = [0, 0], sizes = [32, 96], strides = [1, 1]} : vector<160x96xf32> to vector<32x96xf32>
    %33 = vector.extract_strided_slice %31 {offsets = [32, 0], sizes = [32, 32], strides = [1, 1]} : vector<160x96xf32> to vector<32x32xf32>
    %34 = vector.extract_strided_slice %31 {offsets = [64, 0], sizes = [32, 64], strides = [1, 1]} : vector<160x96xf32> to vector<32x64xf32>
    %35 = vector.extract_strided_slice %31 {offsets = [96, 0], sizes = [64, 32], strides = [1, 1]} : vector<160x96xf32> to vector<64x32xf32>
    %c0_17 = arith.constant 0 : index
    %c0_18 = arith.constant 0 : index
    %c0_19 = arith.constant 0 : index
    %36 = vector.load %arg7[%c0_17, %c0_18, %c0_19] : memref<2x8x96xf32, #tpu.memory_space<vmem>>, vector<1x8x96xf32>
    %37 = vector.shape_cast %36 : vector<1x8x96xf32> to vector<8x96xf32>
    %38 = vector.extract_strided_slice %37 {offsets = [0, 0], sizes = [1, 96], strides = [1, 1]} : vector<8x96xf32> to vector<1x96xf32>
    %39 = vector.extract_strided_slice %37 {offsets = [1, 0], sizes = [1, 32], strides = [1, 1]} : vector<8x96xf32> to vector<1x32xf32>
    %40 = vector.extract_strided_slice %37 {offsets = [2, 0], sizes = [1, 64], strides = [1, 1]} : vector<8x96xf32> to vector<1x64xf32>
    %41 = vector.extract_strided_slice %37 {offsets = [3, 0], sizes = [1, 32], strides = [1, 1]} : vector<8x96xf32> to vector<1x32xf32>
    %42 = vector.extract_strided_slice %37 {offsets = [4, 0], sizes = [1, 32], strides = [1, 1]} : vector<8x96xf32> to vector<1x32xf32>
    %43 = vector.extract_strided_slice %37 {offsets = [5, 0], sizes = [1, 32], strides = [1, 1]} : vector<8x96xf32> to vector<1x32xf32>
    %44 = vector.extract_strided_slice %37 {offsets = [6, 0], sizes = [1, 32], strides = [1, 1]} : vector<8x96xf32> to vector<1x32xf32>
    %45 = vector.extract_strided_slice %37 {offsets = [7, 0], sizes = [1, 32], strides = [1, 1]} : vector<8x96xf32> to vector<1x32xf32>
    %cst_20 = arith.constant dense<0.000000e+00> : vector<16x96xf32>
    %46 = tpu.matmul %28, %32, %cst_20 {dimension_numbers = #tpu.dot_dimension_numbers<[1], [0], [0], [1], [0, 0, 1, 1], [], []>} : vector<16x32xf32>, vector<32x96xf32>, vector<16x96xf32> -> vector<16x96xf32>
    %47 = vector.broadcast %38 : vector<1x96xf32> to vector<16x96xf32>
    %48 = arith.addf %46, %47 : vector<16x96xf32>
    %49 = vector.extract_strided_slice %48 {offsets = [0, 0], sizes = [16, 32], strides = [1, 1]} : vector<16x96xf32> to vector<16x32xf32>
    %50 = vector.extract_strided_slice %48 {offsets = [0, 32], sizes = [16, 32], strides = [1, 1]} : vector<16x96xf32> to vector<16x32xf32>
    %51 = vector.extract_strided_slice %48 {offsets = [0, 64], sizes = [16, 32], strides = [1, 1]} : vector<16x96xf32> to vector<16x32xf32>
    %cst_21 = arith.constant 0.000000e+00 : f32
    %52 = vector.broadcast %cst_21 : f32 to vector<16x32xf32>
    %53 = vector.extract_strided_slice %49 {offsets = [0, 0], sizes = [16, 8], strides = [1, 1]} : vector<16x32xf32> to vector<16x8xf32>
    %54 = vector.extract_strided_slice %50 {offsets = [0, 0], sizes = [16, 8], strides = [1, 1]} : vector<16x32xf32> to vector<16x8xf32>
    %55 = vector.extract_strided_slice %51 {offsets = [0, 0], sizes = [16, 8], strides = [1, 1]} : vector<16x32xf32> to vector<16x8xf32>
    %cst_22 = arith.constant dense<0.000000e+00> : vector<16x16xf32>
    %56 = tpu.matmul %53, %54, %cst_22 {dimension_numbers = #tpu.dot_dimension_numbers<[1], [1], [0], [0], [0, 0, 1, 0], [], []>} : vector<16x8xf32>, vector<16x8xf32>, vector<16x16xf32> -> vector<16x16xf32>
    %cst_23 = arith.constant 0.353553385 : f32
    %57 = vector.broadcast %cst_23 : f32 to vector<16x16xf32>
    %58 = arith.mulf %56, %57 : vector<16x16xf32>
    %59 = arith.addf %58, %29 : vector<16x16xf32>
    %cst_24 = arith.constant dense<0xFF800000> : vector<16xf32>
    %60 = vector.multi_reduction <maximumf>, %59, %cst_24 [1] : vector<16x16xf32> to vector<16xf32>
    %61 = vector.shape_cast %60 : vector<16xf32> to vector<16x1xf32>
    %62 = vector.broadcast %61 : vector<16x1xf32> to vector<16x16xf32>
    %63 = arith.subf %59, %62 : vector<16x16xf32>
    %64 = math.exp %63 : vector<16x16xf32>
    %cst_25 = arith.constant dense<0.000000e+00> : vector<16xf32>
    %65 = vector.multi_reduction <add>, %64, %cst_25 [1] : vector<16x16xf32> to vector<16xf32>
    %66 = vector.shape_cast %65 : vector<16xf32> to vector<16x1xf32>
    %67 = tpu.reciprocal %66 {approx = true} : vector<16x1xf32> -> vector<16x1xf32>
    %68 = vector.broadcast %67 : vector<16x1xf32> to vector<16x16xf32>
    %69 = arith.mulf %64, %68 : vector<16x16xf32>
    %cst_26 = arith.constant dense<0.000000e+00> : vector<16x8xf32>
    %70 = tpu.matmul %69, %55, %cst_26 {dimension_numbers = #tpu.dot_dimension_numbers<[1], [0], [0], [1], [0, 0, 1, 1], [], []>} : vector<16x16xf32>, vector<16x8xf32>, vector<16x8xf32> -> vector<16x8xf32>
    %71 = vector.extract_strided_slice %33 {offsets = [0, 0], sizes = [8, 32], strides = [1, 1]} : vector<32x32xf32> to vector<8x32xf32>
    %cst_27 = arith.constant dense<0.000000e+00> : vector<16x32xf32>
    %72 = tpu.matmul %70, %71, %cst_27 {dimension_numbers = #tpu.dot_dimension_numbers<[1], [0], [0], [1], [0, 0, 1, 1], [], []>} : vector<16x8xf32>, vector<8x32xf32>, vector<16x32xf32> -> vector<16x32xf32>
    %73 = arith.addf %52, %72 : vector<16x32xf32>
    %74 = vector.extract_strided_slice %49 {offsets = [0, 8], sizes = [16, 8], strides = [1, 1]} : vector<16x32xf32> to vector<16x8xf32>
    %75 = vector.extract_strided_slice %50 {offsets = [0, 8], sizes = [16, 8], strides = [1, 1]} : vector<16x32xf32> to vector<16x8xf32>
    %76 = vector.extract_strided_slice %51 {offsets = [0, 8], sizes = [16, 8], strides = [1, 1]} : vector<16x32xf32> to vector<16x8xf32>
    %cst_28 = arith.constant dense<0.000000e+00> : vector<16x16xf32>
    %77 = tpu.matmul %74, %75, %cst_28 {dimension_numbers = #tpu.dot_dimension_numbers<[1], [1], [0], [0], [0, 0, 1, 0], [], []>} : vector<16x8xf32>, vector<16x8xf32>, vector<16x16xf32> -> vector<16x16xf32>
    %cst_29 = arith.constant 0.353553385 : f32
    %78 = vector.broadcast %cst_29 : f32 to vector<16x16xf32>
    %79 = arith.mulf %77, %78 : vector<16x16xf32>
    %80 = arith.addf %79, %29 : vector<16x16xf32>
    %cst_30 = arith.constant dense<0xFF800000> : vector<16xf32>
    %81 = vector.multi_reduction <maximumf>, %80, %cst_30 [1] : vector<16x16xf32> to vector<16xf32>
    %82 = vector.shape_cast %81 : vector<16xf32> to vector<16x1xf32>
    %83 = vector.broadcast %82 : vector<16x1xf32> to vector<16x16xf32>
    %84 = arith.subf %80, %83 : vector<16x16xf32>
    %85 = math.exp %84 : vector<16x16xf32>
    %cst_31 = arith.constant dense<0.000000e+00> : vector<16xf32>
    %86 = vector.multi_reduction <add>, %85, %cst_31 [1] : vector<16x16xf32> to vector<16xf32>
    %87 = vector.shape_cast %86 : vector<16xf32> to vector<16x1xf32>
    %88 = tpu.reciprocal %87 {approx = true} : vector<16x1xf32> -> vector<16x1xf32>
    %89 = vector.broadcast %88 : vector<16x1xf32> to vector<16x16xf32>
    %90 = arith.mulf %85, %89 : vector<16x16xf32>
    %cst_32 = arith.constant dense<0.000000e+00> : vector<16x8xf32>
    %91 = tpu.matmul %90, %76, %cst_32 {dimension_numbers = #tpu.dot_dimension_numbers<[1], [0], [0], [1], [0, 0, 1, 1], [], []>} : vector<16x16xf32>, vector<16x8xf32>, vector<16x8xf32> -> vector<16x8xf32>
    %92 = vector.extract_strided_slice %33 {offsets = [8, 0], sizes = [8, 32], strides = [1, 1]} : vector<32x32xf32> to vector<8x32xf32>
    %cst_33 = arith.constant dense<0.000000e+00> : vector<16x32xf32>
    %93 = tpu.matmul %91, %92, %cst_33 {dimension_numbers = #tpu.dot_dimension_numbers<[1], [0], [0], [1], [0, 0, 1, 1], [], []>} : vector<16x8xf32>, vector<8x32xf32>, vector<16x32xf32> -> vector<16x32xf32>
    %94 = arith.addf %73, %93 : vector<16x32xf32>
    %95 = vector.extract_strided_slice %49 {offsets = [0, 16], sizes = [16, 8], strides = [1, 1]} : vector<16x32xf32> to vector<16x8xf32>
    %96 = vector.extract_strided_slice %50 {offsets = [0, 16], sizes = [16, 8], strides = [1, 1]} : vector<16x32xf32> to vector<16x8xf32>
    %97 = vector.extract_strided_slice %51 {offsets = [0, 16], sizes = [16, 8], strides = [1, 1]} : vector<16x32xf32> to vector<16x8xf32>
    %cst_34 = arith.constant dense<0.000000e+00> : vector<16x16xf32>
    %98 = tpu.matmul %95, %96, %cst_34 {dimension_numbers = #tpu.dot_dimension_numbers<[1], [1], [0], [0], [0, 0, 1, 0], [], []>} : vector<16x8xf32>, vector<16x8xf32>, vector<16x16xf32> -> vector<16x16xf32>
    %cst_35 = arith.constant 0.353553385 : f32
    %99 = vector.broadcast %cst_35 : f32 to vector<16x16xf32>
    %100 = arith.mulf %98, %99 : vector<16x16xf32>
    %101 = arith.addf %100, %29 : vector<16x16xf32>
    %cst_36 = arith.constant dense<0xFF800000> : vector<16xf32>
    %102 = vector.multi_reduction <maximumf>, %101, %cst_36 [1] : vector<16x16xf32> to vector<16xf32>
    %103 = vector.shape_cast %102 : vector<16xf32> to vector<16x1xf32>
    %104 = vector.broadcast %103 : vector<16x1xf32> to vector<16x16xf32>
    %105 = arith.subf %101, %104 : vector<16x16xf32>
    %106 = math.exp %105 : vector<16x16xf32>
    %cst_37 = arith.constant dense<0.000000e+00> : vector<16xf32>
    %107 = vector.multi_reduction <add>, %106, %cst_37 [1] : vector<16x16xf32> to vector<16xf32>
    %108 = vector.shape_cast %107 : vector<16xf32> to vector<16x1xf32>
    %109 = tpu.reciprocal %108 {approx = true} : vector<16x1xf32> -> vector<16x1xf32>
    %110 = vector.broadcast %109 : vector<16x1xf32> to vector<16x16xf32>
    %111 = arith.mulf %106, %110 : vector<16x16xf32>
    %cst_38 = arith.constant dense<0.000000e+00> : vector<16x8xf32>
    %112 = tpu.matmul %111, %97, %cst_38 {dimension_numbers = #tpu.dot_dimension_numbers<[1], [0], [0], [1], [0, 0, 1, 1], [], []>} : vector<16x16xf32>, vector<16x8xf32>, vector<16x8xf32> -> vector<16x8xf32>
    %113 = vector.extract_strided_slice %33 {offsets = [16, 0], sizes = [8, 32], strides = [1, 1]} : vector<32x32xf32> to vector<8x32xf32>
    %cst_39 = arith.constant dense<0.000000e+00> : vector<16x32xf32>
    %114 = tpu.matmul %112, %113, %cst_39 {dimension_numbers = #tpu.dot_dimension_numbers<[1], [0], [0], [1], [0, 0, 1, 1], [], []>} : vector<16x8xf32>, vector<8x32xf32>, vector<16x32xf32> -> vector<16x32xf32>
    %115 = arith.addf %94, %114 : vector<16x32xf32>
    %116 = vector.extract_strided_slice %49 {offsets = [0, 24], sizes = [16, 8], strides = [1, 1]} : vector<16x32xf32> to vector<16x8xf32>
    %117 = vector.extract_strided_slice %50 {offsets = [0, 24], sizes = [16, 8], strides = [1, 1]} : vector<16x32xf32> to vector<16x8xf32>
    %118 = vector.extract_strided_slice %51 {offsets = [0, 24], sizes = [16, 8], strides = [1, 1]} : vector<16x32xf32> to vector<16x8xf32>
    %cst_40 = arith.constant dense<0.000000e+00> : vector<16x16xf32>
    %119 = tpu.matmul %116, %117, %cst_40 {dimension_numbers = #tpu.dot_dimension_numbers<[1], [1], [0], [0], [0, 0, 1, 0], [], []>} : vector<16x8xf32>, vector<16x8xf32>, vector<16x16xf32> -> vector<16x16xf32>
    %cst_41 = arith.constant 0.353553385 : f32
    %120 = vector.broadcast %cst_41 : f32 to vector<16x16xf32>
    %121 = arith.mulf %119, %120 : vector<16x16xf32>
    %122 = arith.addf %121, %29 : vector<16x16xf32>
    %cst_42 = arith.constant dense<0xFF800000> : vector<16xf32>
    %123 = vector.multi_reduction <maximumf>, %122, %cst_42 [1] : vector<16x16xf32> to vector<16xf32>
    %124 = vector.shape_cast %123 : vector<16xf32> to vector<16x1xf32>
    %125 = vector.broadcast %124 : vector<16x1xf32> to vector<16x16xf32>
    %126 = arith.subf %122, %125 : vector<16x16xf32>
    %127 = math.exp %126 : vector<16x16xf32>
    %cst_43 = arith.constant dense<0.000000e+00> : vector<16xf32>
    %128 = vector.multi_reduction <add>, %127, %cst_43 [1] : vector<16x16xf32> to vector<16xf32>
    %129 = vector.shape_cast %128 : vector<16xf32> to vector<16x1xf32>
    %130 = tpu.reciprocal %129 {approx = true} : vector<16x1xf32> -> vector<16x1xf32>
    %131 = vector.broadcast %130 : vector<16x1xf32> to vector<16x16xf32>
    %132 = arith.mulf %127, %131 : vector<16x16xf32>
    %cst_44 = arith.constant dense<0.000000e+00> : vector<16x8xf32>
    %133 = tpu.matmul %132, %118, %cst_44 {dimension_numbers = #tpu.dot_dimension_numbers<[1], [0], [0], [1], [0, 0, 1, 1], [], []>} : vector<16x16xf32>, vector<16x8xf32>, vector<16x8xf32> -> vector<16x8xf32>
    %134 = vector.extract_strided_slice %33 {offsets = [24, 0], sizes = [8, 32], strides = [1, 1]} : vector<32x32xf32> to vector<8x32xf32>
    %cst_45 = arith.constant dense<0.000000e+00> : vector<16x32xf32>
    %135 = tpu.matmul %133, %134, %cst_45 {dimension_numbers = #tpu.dot_dimension_numbers<[1], [0], [0], [1], [0, 0, 1, 1], [], []>} : vector<16x8xf32>, vector<8x32xf32>, vector<16x32xf32> -> vector<16x32xf32>
    %136 = arith.addf %115, %135 : vector<16x32xf32>
    %137 = vector.broadcast %39 : vector<1x32xf32> to vector<16x32xf32>
    %138 = arith.addf %136, %137 : vector<16x32xf32>
    %139 = arith.addf %138, %28 : vector<16x32xf32>
    %cst_46 = arith.constant dense<0.000000e+00> : vector<16xf32>
    %140 = vector.multi_reduction <add>, %139, %cst_46 [1] : vector<16x32xf32> to vector<16xf32>
    %141 = vector.shape_cast %140 : vector<16xf32> to vector<16x1xf32>
    %cst_47 = arith.constant 3.200000e+01 : f32
    %142 = vector.broadcast %cst_47 : f32 to vector<16x1xf32>
    %143 = arith.divf %141, %142 : vector<16x1xf32>
    %144 = vector.broadcast %143 : vector<16x1xf32> to vector<16x32xf32>
    %145 = arith.subf %139, %144 : vector<16x32xf32>
    %146 = arith.mulf %145, %145 : vector<16x32xf32>
    %cst_48 = arith.constant dense<0.000000e+00> : vector<16xf32>
    %147 = vector.multi_reduction <add>, %146, %cst_48 [1] : vector<16x32xf32> to vector<16xf32>
    %148 = vector.shape_cast %147 : vector<16xf32> to vector<16x1xf32>
    %cst_49 = arith.constant 3.200000e+01 : f32
    %149 = vector.broadcast %cst_49 : f32 to vector<16x1xf32>
    %150 = arith.divf %148, %149 : vector<16x1xf32>
    %151 = vector.broadcast %143 : vector<16x1xf32> to vector<16x32xf32>
    %152 = arith.subf %139, %151 : vector<16x32xf32>
    %cst_50 = arith.constant 9.99999996E-13 : f32
    %153 = vector.broadcast %cst_50 : f32 to vector<16x1xf32>
    %154 = arith.addf %150, %153 : vector<16x1xf32>
    %155 = math.rsqrt %154 : vector<16x1xf32>
    %156 = vector.broadcast %155 : vector<16x1xf32> to vector<16x32xf32>
    %157 = arith.mulf %152, %156 : vector<16x32xf32>
    %158 = vector.broadcast %42 : vector<1x32xf32> to vector<16x32xf32>
    %159 = arith.mulf %157, %158 : vector<16x32xf32>
    %160 = vector.broadcast %43 : vector<1x32xf32> to vector<16x32xf32>
    %161 = arith.addf %159, %160 : vector<16x32xf32>
    %cst_51 = arith.constant dense<0.000000e+00> : vector<16x64xf32>
    %162 = tpu.matmul %161, %34, %cst_51 {dimension_numbers = #tpu.dot_dimension_numbers<[1], [0], [0], [1], [0, 0, 1, 1], [], []>} : vector<16x32xf32>, vector<32x64xf32>, vector<16x64xf32> -> vector<16x64xf32>
    %163 = vector.broadcast %40 : vector<1x64xf32> to vector<16x64xf32>
    %164 = arith.addf %162, %163 : vector<16x64xf32>
    %cst_52 = arith.constant 5.000000e-01 : f32
    %165 = vector.broadcast %cst_52 : f32 to vector<16x64xf32>
    %166 = arith.mulf %165, %164 : vector<16x64xf32>
    %cst_53 = arith.constant 4.471500e-02 : f32
    %167 = vector.broadcast %cst_53 : f32 to vector<16x64xf32>
    %168 = arith.mulf %167, %164 : vector<16x64xf32>
    %169 = arith.mulf %168, %164 : vector<16x64xf32>
    %170 = arith.mulf %169, %164 : vector<16x64xf32>
    %171 = arith.addf %164, %170 : vector<16x64xf32>
    %cst_54 = arith.constant 0.797884583 : f32
    %172 = vector.broadcast %cst_54 : f32 to vector<16x64xf32>
    %173 = arith.mulf %172, %171 : vector<16x64xf32>
    %174 = math.tanh %173 : vector<16x64xf32>
    %cst_55 = arith.constant 1.000000e+00 : f32
    %175 = vector.broadcast %cst_55 : f32 to vector<16x64xf32>
    %176 = arith.addf %175, %174 : vector<16x64xf32>
    %177 = arith.mulf %166, %176 : vector<16x64xf32>
    %cst_56 = arith.constant dense<0.000000e+00> : vector<16x32xf32>
    %178 = tpu.matmul %177, %35, %cst_56 {dimension_numbers = #tpu.dot_dimension_numbers<[1], [0], [0], [1], [0, 0, 1, 1], [], []>} : vector<16x64xf32>, vector<64x32xf32>, vector<16x32xf32> -> vector<16x32xf32>
    %179 = vector.broadcast %41 : vector<1x32xf32> to vector<16x32xf32>
    %180 = arith.addf %178, %179 : vector<16x32xf32>
    %181 = arith.addf %180, %161 : vector<16x32xf32>
    %cst_57 = arith.constant dense<0.000000e+00> : vector<16xf32>
    %182 = vector.multi_reduction <add>, %181, %cst_57 [1] : vector<16x32xf32> to vector<16xf32>
    %183 = vector.shape_cast %182 : vector<16xf32> to vector<16x1xf32>
    %cst_58 = arith.constant 3.200000e+01 : f32
    %184 = vector.broadcast %cst_58 : f32 to vector<16x1xf32>
    %185 = arith.divf %183, %184 : vector<16x1xf32>
    %186 = vector.broadcast %185 : vector<16x1xf32> to vector<16x32xf32>
    %187 = arith.subf %181, %186 : vector<16x32xf32>
    %188 = arith.mulf %187, %187 : vector<16x32xf32>
    %cst_59 = arith.constant dense<0.000000e+00> : vector<16xf32>
    %189 = vector.multi_reduction <add>, %188, %cst_59 [1] : vector<16x32xf32> to vector<16xf32>
    %190 = vector.shape_cast %189 : vector<16xf32> to vector<16x1xf32>
    %cst_60 = arith.constant 3.200000e+01 : f32
    %191 = vector.broadcast %cst_60 : f32 to vector<16x1xf32>
    %192 = arith.divf %190, %191 : vector<16x1xf32>
    %193 = vector.broadcast %185 : vector<16x1xf32> to vector<16x32xf32>
    %194 = arith.subf %181, %193 : vector<16x32xf32>
    %cst_61 = arith.constant 9.99999996E-13 : f32
    %195 = vector.broadcast %cst_61 : f32 to vector<16x1xf32>
    %196 = arith.addf %192, %195 : vector<16x1xf32>
    %197 = math.rsqrt %196 : vector<16x1xf32>
    %198 = vector.broadcast %197 : vector<16x1xf32> to vector<16x32xf32>
    %199 = arith.mulf %194, %198 : vector<16x32xf32>
    %200 = vector.broadcast %44 : vector<1x32xf32> to vector<16x32xf32>
    %201 = arith.mulf %199, %200 : vector<16x32xf32>
    %202 = vector.broadcast %45 : vector<1x32xf32> to vector<16x32xf32>
    %203 = arith.addf %201, %202 : vector<16x32xf32>
    %c1 = arith.constant 1 : index
    %c0_62 = arith.constant 0 : index
    %c0_63 = arith.constant 0 : index
    %204 = vector.load %arg6[%c1, %c0_62, %c0_63] : memref<2x160x96xf32, #tpu.memory_space<vmem>>, vector<1x160x96xf32>
    %205 = vector.shape_cast %204 : vector<1x160x96xf32> to vector<160x96xf32>
    %206 = vector.extract_strided_slice %205 {offsets = [0, 0], sizes = [32, 96], strides = [1, 1]} : vector<160x96xf32> to vector<32x96xf32>
    %207 = vector.extract_strided_slice %205 {offsets = [32, 0], sizes = [32, 32], strides = [1, 1]} : vector<160x96xf32> to vector<32x32xf32>
    %208 = vector.extract_strided_slice %205 {offsets = [64, 0], sizes = [32, 64], strides = [1, 1]} : vector<160x96xf32> to vector<32x64xf32>
    %209 = vector.extract_strided_slice %205 {offsets = [96, 0], sizes = [64, 32], strides = [1, 1]} : vector<160x96xf32> to vector<64x32xf32>
    %c1_64 = arith.constant 1 : index
    %c0_65 = arith.constant 0 : index
    %c0_66 = arith.constant 0 : index
    %210 = vector.load %arg7[%c1_64, %c0_65, %c0_66] : memref<2x8x96xf32, #tpu.memory_space<vmem>>, vector<1x8x96xf32>
    %211 = vector.shape_cast %210 : vector<1x8x96xf32> to vector<8x96xf32>
    %212 = vector.extract_strided_slice %211 {offsets = [0, 0], sizes = [1, 96], strides = [1, 1]} : vector<8x96xf32> to vector<1x96xf32>
    %213 = vector.extract_strided_slice %211 {offsets = [1, 0], sizes = [1, 32], strides = [1, 1]} : vector<8x96xf32> to vector<1x32xf32>
    %214 = vector.extract_strided_slice %211 {offsets = [2, 0], sizes = [1, 64], strides = [1, 1]} : vector<8x96xf32> to vector<1x64xf32>
    %215 = vector.extract_strided_slice %211 {offsets = [3, 0], sizes = [1, 32], strides = [1, 1]} : vector<8x96xf32> to vector<1x32xf32>
    %216 = vector.extract_strided_slice %211 {offsets = [4, 0], sizes = [1, 32], strides = [1, 1]} : vector<8x96xf32> to vector<1x32xf32>
    %217 = vector.extract_strided_slice %211 {offsets = [5, 0], sizes = [1, 32], strides = [1, 1]} : vector<8x96xf32> to vector<1x32xf32>
    %218 = vector.extract_strided_slice %211 {offsets = [6, 0], sizes = [1, 32], strides = [1, 1]} : vector<8x96xf32> to vector<1x32xf32>
    %219 = vector.extract_strided_slice %211 {offsets = [7, 0], sizes = [1, 32], strides = [1, 1]} : vector<8x96xf32> to vector<1x32xf32>
    %cst_67 = arith.constant dense<0.000000e+00> : vector<16x96xf32>
    %220 = tpu.matmul %203, %206, %cst_67 {dimension_numbers = #tpu.dot_dimension_numbers<[1], [0], [0], [1], [0, 0, 1, 1], [], []>} : vector<16x32xf32>, vector<32x96xf32>, vector<16x96xf32> -> vector<16x96xf32>
    %221 = vector.broadcast %212 : vector<1x96xf32> to vector<16x96xf32>
    %222 = arith.addf %220, %221 : vector<16x96xf32>
    %223 = vector.extract_strided_slice %222 {offsets = [0, 0], sizes = [16, 32], strides = [1, 1]} : vector<16x96xf32> to vector<16x32xf32>
    %224 = vector.extract_strided_slice %222 {offsets = [0, 32], sizes = [16, 32], strides = [1, 1]} : vector<16x96xf32> to vector<16x32xf32>
    %225 = vector.extract_strided_slice %222 {offsets = [0, 64], sizes = [16, 32], strides = [1, 1]} : vector<16x96xf32> to vector<16x32xf32>
    %cst_68 = arith.constant 0.000000e+00 : f32
    %226 = vector.broadcast %cst_68 : f32 to vector<16x32xf32>
    %227 = vector.extract_strided_slice %223 {offsets = [0, 0], sizes = [16, 8], strides = [1, 1]} : vector<16x32xf32> to vector<16x8xf32>
    %228 = vector.extract_strided_slice %224 {offsets = [0, 0], sizes = [16, 8], strides = [1, 1]} : vector<16x32xf32> to vector<16x8xf32>
    %229 = vector.extract_strided_slice %225 {offsets = [0, 0], sizes = [16, 8], strides = [1, 1]} : vector<16x32xf32> to vector<16x8xf32>
    %cst_69 = arith.constant dense<0.000000e+00> : vector<16x16xf32>
    %230 = tpu.matmul %227, %228, %cst_69 {dimension_numbers = #tpu.dot_dimension_numbers<[1], [1], [0], [0], [0, 0, 1, 0], [], []>} : vector<16x8xf32>, vector<16x8xf32>, vector<16x16xf32> -> vector<16x16xf32>
    %cst_70 = arith.constant 0.353553385 : f32
    %231 = vector.broadcast %cst_70 : f32 to vector<16x16xf32>
    %232 = arith.mulf %230, %231 : vector<16x16xf32>
    %233 = arith.addf %232, %29 : vector<16x16xf32>
    %cst_71 = arith.constant dense<0xFF800000> : vector<16xf32>
    %234 = vector.multi_reduction <maximumf>, %233, %cst_71 [1] : vector<16x16xf32> to vector<16xf32>
    %235 = vector.shape_cast %234 : vector<16xf32> to vector<16x1xf32>
    %236 = vector.broadcast %235 : vector<16x1xf32> to vector<16x16xf32>
    %237 = arith.subf %233, %236 : vector<16x16xf32>
    %238 = math.exp %237 : vector<16x16xf32>
    %cst_72 = arith.constant dense<0.000000e+00> : vector<16xf32>
    %239 = vector.multi_reduction <add>, %238, %cst_72 [1] : vector<16x16xf32> to vector<16xf32>
    %240 = vector.shape_cast %239 : vector<16xf32> to vector<16x1xf32>
    %241 = tpu.reciprocal %240 {approx = true} : vector<16x1xf32> -> vector<16x1xf32>
    %242 = vector.broadcast %241 : vector<16x1xf32> to vector<16x16xf32>
    %243 = arith.mulf %238, %242 : vector<16x16xf32>
    %cst_73 = arith.constant dense<0.000000e+00> : vector<16x8xf32>
    %244 = tpu.matmul %243, %229, %cst_73 {dimension_numbers = #tpu.dot_dimension_numbers<[1], [0], [0], [1], [0, 0, 1, 1], [], []>} : vector<16x16xf32>, vector<16x8xf32>, vector<16x8xf32> -> vector<16x8xf32>
    %245 = vector.extract_strided_slice %207 {offsets = [0, 0], sizes = [8, 32], strides = [1, 1]} : vector<32x32xf32> to vector<8x32xf32>
    %cst_74 = arith.constant dense<0.000000e+00> : vector<16x32xf32>
    %246 = tpu.matmul %244, %245, %cst_74 {dimension_numbers = #tpu.dot_dimension_numbers<[1], [0], [0], [1], [0, 0, 1, 1], [], []>} : vector<16x8xf32>, vector<8x32xf32>, vector<16x32xf32> -> vector<16x32xf32>
    %247 = arith.addf %226, %246 : vector<16x32xf32>
    %248 = vector.extract_strided_slice %223 {offsets = [0, 8], sizes = [16, 8], strides = [1, 1]} : vector<16x32xf32> to vector<16x8xf32>
    %249 = vector.extract_strided_slice %224 {offsets = [0, 8], sizes = [16, 8], strides = [1, 1]} : vector<16x32xf32> to vector<16x8xf32>
    %250 = vector.extract_strided_slice %225 {offsets = [0, 8], sizes = [16, 8], strides = [1, 1]} : vector<16x32xf32> to vector<16x8xf32>
    %cst_75 = arith.constant dense<0.000000e+00> : vector<16x16xf32>
    %251 = tpu.matmul %248, %249, %cst_75 {dimension_numbers = #tpu.dot_dimension_numbers<[1], [1], [0], [0], [0, 0, 1, 0], [], []>} : vector<16x8xf32>, vector<16x8xf32>, vector<16x16xf32> -> vector<16x16xf32>
    %cst_76 = arith.constant 0.353553385 : f32
    %252 = vector.broadcast %cst_76 : f32 to vector<16x16xf32>
    %253 = arith.mulf %251, %252 : vector<16x16xf32>
    %254 = arith.addf %253, %29 : vector<16x16xf32>
    %cst_77 = arith.constant dense<0xFF800000> : vector<16xf32>
    %255 = vector.multi_reduction <maximumf>, %254, %cst_77 [1] : vector<16x16xf32> to vector<16xf32>
    %256 = vector.shape_cast %255 : vector<16xf32> to vector<16x1xf32>
    %257 = vector.broadcast %256 : vector<16x1xf32> to vector<16x16xf32>
    %258 = arith.subf %254, %257 : vector<16x16xf32>
    %259 = math.exp %258 : vector<16x16xf32>
    %cst_78 = arith.constant dense<0.000000e+00> : vector<16xf32>
    %260 = vector.multi_reduction <add>, %259, %cst_78 [1] : vector<16x16xf32> to vector<16xf32>
    %261 = vector.shape_cast %260 : vector<16xf32> to vector<16x1xf32>
    %262 = tpu.reciprocal %261 {approx = true} : vector<16x1xf32> -> vector<16x1xf32>
    %263 = vector.broadcast %262 : vector<16x1xf32> to vector<16x16xf32>
    %264 = arith.mulf %259, %263 : vector<16x16xf32>
    %cst_79 = arith.constant dense<0.000000e+00> : vector<16x8xf32>
    %265 = tpu.matmul %264, %250, %cst_79 {dimension_numbers = #tpu.dot_dimension_numbers<[1], [0], [0], [1], [0, 0, 1, 1], [], []>} : vector<16x16xf32>, vector<16x8xf32>, vector<16x8xf32> -> vector<16x8xf32>
    %266 = vector.extract_strided_slice %207 {offsets = [8, 0], sizes = [8, 32], strides = [1, 1]} : vector<32x32xf32> to vector<8x32xf32>
    %cst_80 = arith.constant dense<0.000000e+00> : vector<16x32xf32>
    %267 = tpu.matmul %265, %266, %cst_80 {dimension_numbers = #tpu.dot_dimension_numbers<[1], [0], [0], [1], [0, 0, 1, 1], [], []>} : vector<16x8xf32>, vector<8x32xf32>, vector<16x32xf32> -> vector<16x32xf32>
    %268 = arith.addf %247, %267 : vector<16x32xf32>
    %269 = vector.extract_strided_slice %223 {offsets = [0, 16], sizes = [16, 8], strides = [1, 1]} : vector<16x32xf32> to vector<16x8xf32>
    %270 = vector.extract_strided_slice %224 {offsets = [0, 16], sizes = [16, 8], strides = [1, 1]} : vector<16x32xf32> to vector<16x8xf32>
    %271 = vector.extract_strided_slice %225 {offsets = [0, 16], sizes = [16, 8], strides = [1, 1]} : vector<16x32xf32> to vector<16x8xf32>
    %cst_81 = arith.constant dense<0.000000e+00> : vector<16x16xf32>
    %272 = tpu.matmul %269, %270, %cst_81 {dimension_numbers = #tpu.dot_dimension_numbers<[1], [1], [0], [0], [0, 0, 1, 0], [], []>} : vector<16x8xf32>, vector<16x8xf32>, vector<16x16xf32> -> vector<16x16xf32>
    %cst_82 = arith.constant 0.353553385 : f32
    %273 = vector.broadcast %cst_82 : f32 to vector<16x16xf32>
    %274 = arith.mulf %272, %273 : vector<16x16xf32>
    %275 = arith.addf %274, %29 : vector<16x16xf32>
    %cst_83 = arith.constant dense<0xFF800000> : vector<16xf32>
    %276 = vector.multi_reduction <maximumf>, %275, %cst_83 [1] : vector<16x16xf32> to vector<16xf32>
    %277 = vector.shape_cast %276 : vector<16xf32> to vector<16x1xf32>
    %278 = vector.broadcast %277 : vector<16x1xf32> to vector<16x16xf32>
    %279 = arith.subf %275, %278 : vector<16x16xf32>
    %280 = math.exp %279 : vector<16x16xf32>
    %cst_84 = arith.constant dense<0.000000e+00> : vector<16xf32>
    %281 = vector.multi_reduction <add>, %280, %cst_84 [1] : vector<16x16xf32> to vector<16xf32>
    %282 = vector.shape_cast %281 : vector<16xf32> to vector<16x1xf32>
    %283 = tpu.reciprocal %282 {approx = true} : vector<16x1xf32> -> vector<16x1xf32>
    %284 = vector.broadcast %283 : vector<16x1xf32> to vector<16x16xf32>
    %285 = arith.mulf %280, %284 : vector<16x16xf32>
    %cst_85 = arith.constant dense<0.000000e+00> : vector<16x8xf32>
    %286 = tpu.matmul %285, %271, %cst_85 {dimension_numbers = #tpu.dot_dimension_numbers<[1], [0], [0], [1], [0, 0, 1, 1], [], []>} : vector<16x16xf32>, vector<16x8xf32>, vector<16x8xf32> -> vector<16x8xf32>
    %287 = vector.extract_strided_slice %207 {offsets = [16, 0], sizes = [8, 32], strides = [1, 1]} : vector<32x32xf32> to vector<8x32xf32>
    %cst_86 = arith.constant dense<0.000000e+00> : vector<16x32xf32>
    %288 = tpu.matmul %286, %287, %cst_86 {dimension_numbers = #tpu.dot_dimension_numbers<[1], [0], [0], [1], [0, 0, 1, 1], [], []>} : vector<16x8xf32>, vector<8x32xf32>, vector<16x32xf32> -> vector<16x32xf32>
    %289 = arith.addf %268, %288 : vector<16x32xf32>
    %290 = vector.extract_strided_slice %223 {offsets = [0, 24], sizes = [16, 8], strides = [1, 1]} : vector<16x32xf32> to vector<16x8xf32>
    %291 = vector.extract_strided_slice %224 {offsets = [0, 24], sizes = [16, 8], strides = [1, 1]} : vector<16x32xf32> to vector<16x8xf32>
    %292 = vector.extract_strided_slice %225 {offsets = [0, 24], sizes = [16, 8], strides = [1, 1]} : vector<16x32xf32> to vector<16x8xf32>
    %cst_87 = arith.constant dense<0.000000e+00> : vector<16x16xf32>
    %293 = tpu.matmul %290, %291, %cst_87 {dimension_numbers = #tpu.dot_dimension_numbers<[1], [1], [0], [0], [0, 0, 1, 0], [], []>} : vector<16x8xf32>, vector<16x8xf32>, vector<16x16xf32> -> vector<16x16xf32>
    %cst_88 = arith.constant 0.353553385 : f32
    %294 = vector.broadcast %cst_88 : f32 to vector<16x16xf32>
    %295 = arith.mulf %293, %294 : vector<16x16xf32>
    %296 = arith.addf %295, %29 : vector<16x16xf32>
    %cst_89 = arith.constant dense<0xFF800000> : vector<16xf32>
    %297 = vector.multi_reduction <maximumf>, %296, %cst_89 [1] : vector<16x16xf32> to vector<16xf32>
    %298 = vector.shape_cast %297 : vector<16xf32> to vector<16x1xf32>
    %299 = vector.broadcast %298 : vector<16x1xf32> to vector<16x16xf32>
    %300 = arith.subf %296, %299 : vector<16x16xf32>
    %301 = math.exp %300 : vector<16x16xf32>
    %cst_90 = arith.constant dense<0.000000e+00> : vector<16xf32>
    %302 = vector.multi_reduction <add>, %301, %cst_90 [1] : vector<16x16xf32> to vector<16xf32>
    %303 = vector.shape_cast %302 : vector<16xf32> to vector<16x1xf32>
    %304 = tpu.reciprocal %303 {approx = true} : vector<16x1xf32> -> vector<16x1xf32>
    %305 = vector.broadcast %304 : vector<16x1xf32> to vector<16x16xf32>
    %306 = arith.mulf %301, %305 : vector<16x16xf32>
    %cst_91 = arith.constant dense<0.000000e+00> : vector<16x8xf32>
    %307 = tpu.matmul %306, %292, %cst_91 {dimension_numbers = #tpu.dot_dimension_numbers<[1], [0], [0], [1], [0, 0, 1, 1], [], []>} : vector<16x16xf32>, vector<16x8xf32>, vector<16x8xf32> -> vector<16x8xf32>
    %308 = vector.extract_strided_slice %207 {offsets = [24, 0], sizes = [8, 32], strides = [1, 1]} : vector<32x32xf32> to vector<8x32xf32>
    %cst_92 = arith.constant dense<0.000000e+00> : vector<16x32xf32>
    %309 = tpu.matmul %307, %308, %cst_92 {dimension_numbers = #tpu.dot_dimension_numbers<[1], [0], [0], [1], [0, 0, 1, 1], [], []>} : vector<16x8xf32>, vector<8x32xf32>, vector<16x32xf32> -> vector<16x32xf32>
    %310 = arith.addf %289, %309 : vector<16x32xf32>
    %311 = vector.broadcast %213 : vector<1x32xf32> to vector<16x32xf32>
    %312 = arith.addf %310, %311 : vector<16x32xf32>
    %313 = arith.addf %312, %203 : vector<16x32xf32>
    %cst_93 = arith.constant dense<0.000000e+00> : vector<16xf32>
    %314 = vector.multi_reduction <add>, %313, %cst_93 [1] : vector<16x32xf32> to vector<16xf32>
    %315 = vector.shape_cast %314 : vector<16xf32> to vector<16x1xf32>
    %cst_94 = arith.constant 3.200000e+01 : f32
    %316 = vector.broadcast %cst_94 : f32 to vector<16x1xf32>
    %317 = arith.divf %315, %316 : vector<16x1xf32>
    %318 = vector.broadcast %317 : vector<16x1xf32> to vector<16x32xf32>
    %319 = arith.subf %313, %318 : vector<16x32xf32>
    %320 = arith.mulf %319, %319 : vector<16x32xf32>
    %cst_95 = arith.constant dense<0.000000e+00> : vector<16xf32>
    %321 = vector.multi_reduction <add>, %320, %cst_95 [1] : vector<16x32xf32> to vector<16xf32>
    %322 = vector.shape_cast %321 : vector<16xf32> to vector<16x1xf32>
    %cst_96 = arith.constant 3.200000e+01 : f32
    %323 = vector.broadcast %cst_96 : f32 to vector<16x1xf32>
    %324 = arith.divf %322, %323 : vector<16x1xf32>
    %325 = vector.broadcast %317 : vector<16x1xf32> to vector<16x32xf32>
    %326 = arith.subf %313, %325 : vector<16x32xf32>
    %cst_97 = arith.constant 9.99999996E-13 : f32
    %327 = vector.broadcast %cst_97 : f32 to vector<16x1xf32>
    %328 = arith.addf %324, %327 : vector<16x1xf32>
    %329 = math.rsqrt %328 : vector<16x1xf32>
    %330 = vector.broadcast %329 : vector<16x1xf32> to vector<16x32xf32>
    %331 = arith.mulf %326, %330 : vector<16x32xf32>
    %332 = vector.broadcast %216 : vector<1x32xf32> to vector<16x32xf32>
    %333 = arith.mulf %331, %332 : vector<16x32xf32>
    %334 = vector.broadcast %217 : vector<1x32xf32> to vector<16x32xf32>
    %335 = arith.addf %333, %334 : vector<16x32xf32>
    %cst_98 = arith.constant dense<0.000000e+00> : vector<16x64xf32>
    %336 = tpu.matmul %335, %208, %cst_98 {dimension_numbers = #tpu.dot_dimension_numbers<[1], [0], [0], [1], [0, 0, 1, 1], [], []>} : vector<16x32xf32>, vector<32x64xf32>, vector<16x64xf32> -> vector<16x64xf32>
    %337 = vector.broadcast %214 : vector<1x64xf32> to vector<16x64xf32>
    %338 = arith.addf %336, %337 : vector<16x64xf32>
    %cst_99 = arith.constant 5.000000e-01 : f32
    %339 = vector.broadcast %cst_99 : f32 to vector<16x64xf32>
    %340 = arith.mulf %339, %338 : vector<16x64xf32>
    %cst_100 = arith.constant 4.471500e-02 : f32
    %341 = vector.broadcast %cst_100 : f32 to vector<16x64xf32>
    %342 = arith.mulf %341, %338 : vector<16x64xf32>
    %343 = arith.mulf %342, %338 : vector<16x64xf32>
    %344 = arith.mulf %343, %338 : vector<16x64xf32>
    %345 = arith.addf %338, %344 : vector<16x64xf32>
    %cst_101 = arith.constant 0.797884583 : f32
    %346 = vector.broadcast %cst_101 : f32 to vector<16x64xf32>
    %347 = arith.mulf %346, %345 : vector<16x64xf32>
    %348 = math.tanh %347 : vector<16x64xf32>
    %cst_102 = arith.constant 1.000000e+00 : f32
    %349 = vector.broadcast %cst_102 : f32 to vector<16x64xf32>
    %350 = arith.addf %349, %348 : vector<16x64xf32>
    %351 = arith.mulf %340, %350 : vector<16x64xf32>
    %cst_103 = arith.constant dense<0.000000e+00> : vector<16x32xf32>
    %352 = tpu.matmul %351, %209, %cst_103 {dimension_numbers = #tpu.dot_dimension_numbers<[1], [0], [0], [1], [0, 0, 1, 1], [], []>} : vector<16x64xf32>, vector<64x32xf32>, vector<16x32xf32> -> vector<16x32xf32>
    %353 = vector.broadcast %215 : vector<1x32xf32> to vector<16x32xf32>
    %354 = arith.addf %352, %353 : vector<16x32xf32>
    %355 = arith.addf %354, %335 : vector<16x32xf32>
    %cst_104 = arith.constant dense<0.000000e+00> : vector<16xf32>
    %356 = vector.multi_reduction <add>, %355, %cst_104 [1] : vector<16x32xf32> to vector<16xf32>
    %357 = vector.shape_cast %356 : vector<16xf32> to vector<16x1xf32>
    %cst_105 = arith.constant 3.200000e+01 : f32
    %358 = vector.broadcast %cst_105 : f32 to vector<16x1xf32>
    %359 = arith.divf %357, %358 : vector<16x1xf32>
    %360 = vector.broadcast %359 : vector<16x1xf32> to vector<16x32xf32>
    %361 = arith.subf %355, %360 : vector<16x32xf32>
    %362 = arith.mulf %361, %361 : vector<16x32xf32>
    %cst_106 = arith.constant dense<0.000000e+00> : vector<16xf32>
    %363 = vector.multi_reduction <add>, %362, %cst_106 [1] : vector<16x32xf32> to vector<16xf32>
    %364 = vector.shape_cast %363 : vector<16xf32> to vector<16x1xf32>
    %cst_107 = arith.constant 3.200000e+01 : f32
    %365 = vector.broadcast %cst_107 : f32 to vector<16x1xf32>
    %366 = arith.divf %364, %365 : vector<16x1xf32>
    %367 = vector.broadcast %359 : vector<16x1xf32> to vector<16x32xf32>
    %368 = arith.subf %355, %367 : vector<16x32xf32>
    %cst_108 = arith.constant 9.99999996E-13 : f32
    %369 = vector.broadcast %cst_108 : f32 to vector<16x1xf32>
    %370 = arith.addf %366, %369 : vector<16x1xf32>
    %371 = math.rsqrt %370 : vector<16x1xf32>
    %372 = vector.broadcast %371 : vector<16x1xf32> to vector<16x32xf32>
    %373 = arith.mulf %368, %372 : vector<16x32xf32>
    %374 = vector.broadcast %218 : vector<1x32xf32> to vector<16x32xf32>
    %375 = arith.mulf %373, %374 : vector<16x32xf32>
    %376 = vector.broadcast %219 : vector<1x32xf32> to vector<16x32xf32>
    %377 = arith.addf %375, %376 : vector<16x32xf32>
    %c66 = arith.constant 66 : index
    %c0_109 = arith.constant 0 : index
    %378 = vector.load %arg4[%c66, %c0_109] : memref<99x32xf32, #tpu.memory_space<vmem>>, vector<32x32xf32>
    %c98 = arith.constant 98 : index
    %c0_110 = arith.constant 0 : index
    %379 = vector.load %arg4[%c98, %c0_110] : memref<99x32xf32, #tpu.memory_space<vmem>>, vector<1x32xf32>
    %cst_111 = arith.constant dense<0.000000e+00> : vector<16x32xf32>
    %380 = tpu.matmul %377, %378, %cst_111 {dimension_numbers = #tpu.dot_dimension_numbers<[1], [0], [0], [1], [0, 0, 1, 1], [], []>} : vector<16x32xf32>, vector<32x32xf32>, vector<16x32xf32> -> vector<16x32xf32>
    %381 = vector.broadcast %379 : vector<1x32xf32> to vector<16x32xf32>
    %382 = arith.addf %380, %381 : vector<16x32xf32>
    %383 = math.tanh %382 : vector<16x32xf32>
    %c0_112 = arith.constant 0 : index
    %c0_113 = arith.constant 0 : index
    %384 = vector.load %arg5[%c0_112, %c0_113] : memref<33x128xf32, #tpu.memory_space<vmem>>, vector<32x128xf32>
    %c32 = arith.constant 32 : index
    %c0_114 = arith.constant 0 : index
    %385 = vector.load %arg5[%c32, %c0_114] : memref<33x128xf32, #tpu.memory_space<vmem>>, vector<1x128xf32>
    %cst_115 = arith.constant dense<0.000000e+00> : vector<16x128xf32>
    %386 = tpu.matmul %383, %384, %cst_115 {dimension_numbers = #tpu.dot_dimension_numbers<[1], [0], [0], [1], [0, 0, 1, 1], [], []>} : vector<16x32xf32>, vector<32x128xf32>, vector<16x128xf32> -> vector<16x128xf32>
    %387 = vector.broadcast %385 : vector<1x128xf32> to vector<16x128xf32>
    %388 = arith.addf %386, %387 : vector<16x128xf32>
    %c0_116 = arith.constant 0 : index
    %c0_117 = arith.constant 0 : index
    %389 = vector.load %arg8[%c0_116, %c0_117] : memref<16x128xf32, #tpu.memory_space<vmem>>, vector<16x128xf32>
    tpu.vector_store %arg8[%c0_116, %c0_117], %388 {strides = array<i32>} : memref<16x128xf32, #tpu.memory_space<vmem>>, vector<16x128xf32>,
    return
  }
  func.func @transform_0(%arg0: i32) -> (i32, i32) {
    %c0_i32 = arith.constant 0 : i32
    %c0_i32_0 = arith.constant 0 : i32
    %c0_i32_1 = arith.constant 0 : i32
    return %c0_i32, %c0_i32_0 : i32, i32
  }
  func.func @transform_1(%arg0: i32) -> (i32, i32) {
    %c0_i32 = arith.constant 0 : i32
    %c0_i32_0 = arith.constant 0 : i32
    %c0_i32_1 = arith.constant 0 : i32
    return %c0_i32, %c0_i32_0 : i32, i32
  }
  func.func @transform_2(%arg0: i32) -> (i32, i32) {
    %c0_i32 = arith.constant 0 : i32
    %c0_i32_0 = arith.constant 0 : i32
    %c0_i32_1 = arith.constant 0 : i32
    return %c0_i32, %c0_i32_0 : i32, i32
  }
  func.func @transform_3(%arg0: i32) -> (i32, i32) {
    %c0_i32 = arith.constant 0 : i32
    %c0_i32_0 = arith.constant 0 : i32
    %c0_i32_1 = arith.constant 0 : i32
    return %c0_i32, %c0_i32_0 : i32, i32
  }
  func.func @transform_4(%arg0: i32) -> (i32, i32) {
    %c0_i32 = arith.constant 0 : i32
    %c0_i32_0 = arith.constant 0 : i32
    %c0_i32_1 = arith.constant 0 : i32
    return %c0_i32, %c0_i32_0 : i32, i32
  }
  func.func @transform_5(%arg0: i32) -> (i32, i32, i32) {
    %c0_i32 = arith.constant 0 : i32
    %c0_i32_0 = arith.constant 0 : i32
    %c0_i32_1 = arith.constant 0 : i32
    %c0_i32_2 = arith.constant 0 : i32
    return %c0_i32, %c0_i32_0, %c0_i32_1 : i32, i32, i32
  }
  func.func @transform_6(%arg0: i32) -> (i32, i32, i32) {
    %c0_i32 = arith.constant 0 : i32
    %c0_i32_0 = arith.constant 0 : i32
    %c0_i32_1 = arith.constant 0 : i32
    %c0_i32_2 = arith.constant 0 : i32
    return %c0_i32, %c0_i32_0, %c0_i32_1 : i32, i32, i32
  }
  func.func @transform_7(%arg0: i32) -> (i32, i32) {
    %c0_i32 = arith.constant 0 : i32
    %c0_i32_0 = arith.constant 0 : i32
    %c0_i32_1 = arith.constant 0 : i32
    return %c0_i32, %c0_i32_0 : i32, i32
  }
}

</mosaic_0001>

<bundles_post_ra>
// kernel: eq.1
= control target key start
LH: loop header
LB: loop body
LE: loop exit
PB: predicated region body
PF: predicated region fallthrough
CT: control target
= control target key end

     0   :  { %vm7_vm0 = vcmask 64512   ;;  %vm13_vm1 = vcmask 130112   ;;  %s39_s0 = inlined_call_operand.vmem [shape: s32[2,8], index: 0, kind: input, shape index: {}]   ;;  %s40_s1 = inlined_call_operand.vmem [shape: s32[16], index: 1, kind: output, shape index: {}]  }
   0x1   :  { %v4_v0 = vld [vmem:[%s39_s0] sm:$0x3]  ;;  %s22_s0 = smov 8  }
   0x2   :  { %5 = vst [vmem:[#allocation1] sm:$0x3] %v4_v0 }
   0x9   :  { %v10_v1 = vld [vmem:[#allocation1 + $0x1] sm:$0x1]   ;;  %v6_v2 = vld [vmem:[#allocation1] sm:$0x1]  }
   0xa   :  { %11 = vrot.lane.b32.xlu0 %v10_v1, %s22_s0  ;;  %8 = vst.msk [vmem:[#allocation0] sm:$0x1] %vm7_vm0, %v6_v2  }
  0x7c   :  { %v12_v3 = vpop.permute.xlu0 %11  }
  0x7d   :  { %14 = vst.msk [vmem:[#allocation0] sm:$0x1] %vm13_vm1, %v12_v3  }
  0x84   :  { %v18_v4 = vld [vmem:[#allocation0] sm:$0x1] }
  0x85   :  { %20 = vst [vmem:[%s40_s1] sm:$0x1] %v18_v4 }

// kernel: bert_emotion_forward.1
= control target key start
LH: loop header
LB: loop body
LE: loop exit
PB: predicated region body
PF: predicated region fallthrough
CT: control target
= control target key end

     0   :  { %vm38_vm0 = vcmask 523264   ;;  %vm122_vm1 = vcmask 261120   ;;  %v185_v54 = vlaneseq  ;;  %vm276_vm2 = vcmask 64512   ;;  %s4313_s14 = smov 88   ;;  %s4314_s15 = smov 96   ;;  %s4908_s3 = inlined_call_operand.vmem [shape: f32[99,32], index: 3, kind: input, shape index: {}]   ;;  %s4909_s0 = inlined_call_operand.vmem [shape: f32[16,64], index: 0, kind: input, shape index: {}]   ;;  %s4910_s1 = inlined_call_operand.vmem [shape: f32[16,32], index: 1, kind: input, shape index: {}]   ;;  %s4911_s5 = inlined_call_operand.vmem [shape: f32[2,160,96], index: 5, kind: input, shape index: {}]   ;;  %s4912_s6 = inlined_call_operand.vmem [shape: f32[2,8,96], index: 6, kind: input, shape index: {}]   ;;  %s4913_s2 = inlined_call_operand.vmem [shape: f32[16,16], index: 2, kind: input, shape index: {}]   ;;  %s4914_s4 = inlined_call_operand.vmem [shape: f32[33,128], index: 4, kind: input, shape index: {}]   ;;  %s4915_s7 = inlined_call_operand.vmem [shape: f32[16,128], index: 7, kind: output, shape index: {}]  }
   0x1   :  { %v26_v0 = vld [vmem:[%s4908_s3] sm:$0xff]  ;;  %v27_v1 = vld [vmem:[%s4908_s3 + $0x8] sm:$0xff]  ;;  %v28_v2 = vld [vmem:[%s4908_s3 + $0x10] sm:$0xff]  ;;  %s4315_s16 = smov 120   ;;  %s4316_s17 = smov 80   ;;  %vm364_vm4 = vcmask 130048  }
   0x2   :  { %v3936_v3 = vpack.c.bf16 %v27_v1, %v26_v0  ;;  %v29_v4 = vld [vmem:[%s4908_s3 + $0x18] sm:$0xff]  ;;  %v30_v6 = vld [vmem:[%s4908_s3 + $0x20] sm:$0xff]  ;;  %v31_v7 = vld [vmem:[%s4908_s3 + $0x28] sm:$0xff]  ;;  %v4432_v55 = vshrl.u32 %v185_v54, 7  ;;  %s4317_s18 = smov 112   ;;  %s4318_s23 = smov 64  }
   0x3   :  { %v3940_v5 = vpack.c.bf16 %v29_v4, %v28_v2  ;;  %v34_v8 = vld [vmem:[%s4909_s0] sm:$0xff]  ;;  %v3944_v9 = vpack.c.bf16 %v31_v7, %v30_v6  ;;  %v32_v10 = vld [vmem:[%s4908_s3 + $0x30] sm:$0xff]  ;;  %v33_v11 = vld [vmem:[%s4908_s3 + $0x38] sm:$0xff]  ;;  %s4319_s24 = smov 72   ;;  %s4322_s29 = smov 48  }
   0x4   :  { %3937 = vmatprep.subr.bf16.mxu0 %v3936_v3  ;;  %3677 = vmatprep.mubr.msk.f32.mxu0 %vm38_vm0, %v34_v8  ;;  %v3948_v12 = vpack.c.bf16 %v33_v11, %v32_v10  ;;  %v35_v13 = vld [vmem:[%s4909_s0 + $0x8] sm:$0xff]  ;;  %v36_v14 = vld [vmem:[%s4910_s1] sm:$0xff]  ;;  %v166_v34 = vld [vmem:[%s4911_s5 + $0x10] sm:$0xff]  ;;  %v187_v56 = vsub.s32 0, %v4432_v55  ;;  %s4320_s0 = smov 104   ;;  %s4323_s9 = smov 40  }
   0x5   :  { %3939 = vmatpush3.bf16.msra.mxu0 %v3936_v3  ;;  %v37_v16 = vld [vmem:[%s4910_s1 + $0x8] sm:$0xff]  ;;  %v164_v32 = vld [vmem:[%s4911_s5] sm:$0xff]  ;;  %v167_v36 = vld [vmem:[%s4911_s5 + $0x18] sm:$0xff]  ;;  %s4321_s1 = smov 56  }
   0x6   :  { %3941 = vmatprep.subr.bf16.mxu0 %v3940_v5  ;;  %v165_v33 = vld [vmem:[%s4911_s5 + $0x8] sm:$0xff]  ;;  %v3956_v37 = vpack.c.bf16 %v167_v36, %v166_v34  ;;  %v3402_v45 = vld [vmem:[%s4908_s3 + $0x40] ss:$0 sm:$0xff]  ;;  %v3403_v47 = vld [vmem:[%s4908_s3 + $0x41] ss:$0 sm:$0xff] }
   0x7   :  { %v3952_v35 = vpack.c.bf16 %v165_v33, %v164_v32  ;;  %v4438_v57 = vld [vmem:[%s4912_s6] sm:$0xff]  ;;  %vm4469_vm3 = vmpackc.low %vm276_vm2, %vm276_vm2 }
   0x8   :  { %v188_v58 = vrot.slane %v4438_v57, %v187_v56 }
   0x9   :  { %3943 = vmatpush3.bf16.msra.mxu0 %v3940_v5  ;;  %3953 = vmatprep.subr.bf16.mxu1 %v3952_v35 }
   0xa   :  { %3945 = vmatprep.subr.bf16.mxu0 %v3944_v9  ;;  %3955 = vmatpush3.bf16.msra.mxu1 %v3952_v35 }
   0xb   :  { %3957 = vmatprep.subr.bf16.mxu1 %v3956_v37 }
   0xd   :  { %3947 = vmatpush3.bf16.msra.mxu0 %v3944_v9 }
   0xe   :  { %3949 = vmatprep.subr.bf16.mxu0 %v3948_v12  ;;  %3959 = vmatpush3.bf16.msra.mxu1 %v3956_v37 }
  0x11   :  { %3951 = vmatpush3.bf16.msra.mxu0 %v3948_v12 }
  0x14   :  { %3678 = vmatmul.mubr.msk.f32.vlgmr.msra.gmra.mrb[0].mxu0 %vm38_vm0, %v35_v13 }
  0xe7   :  { %v3679_v15 = vpop.f32.mrb[0].mxu0 }
  0xe8   :  { %v111_v17 = vpop.f32.mrb[1].mxu0  ;;  %v117_v19 = vadd.f32 %v3679_v15, %v37_v16 }
  0xe9   :  { %v112_v18 = vadd.f32 %v111_v17, %v36_v14 }
  0xea   :  { %v126_v21 = vsel %vm122_vm1, %v117_v19, 0.0 }
  0xeb   :  { %v123_v20 = vsel %vm122_vm1, %v112_v18, 0.0 }
  0xec   :  { %124 = vadd.xlane.f32.xlu0 %v123_v20 }
  0xf0   :  { %127 = vadd.xlane.f32.xlu0 %v126_v21  ;;  %v4499_v21 = vld [vmem:[%s4913_s2] sm:$0xff] }
 0x179   :  { %v125_v22 = vpop.xlane.xlu0 %124 }
 0x17a   :  { %v130_v23 = vmul.f32 0.03125, %v125_v22 }
 0x17c   :  { %v132_v24 = vsub.f32 %v112_v18, %v130_v23  ;;  %v4494_v18 = vld [vmem:[%s4913_s2 + $0x8] sm:$0xff] }
 0x17d   :  { %v128_v25 = vpop.xlane.xlu0 %127 }
 0x17e   :  { %v131_v26 = vmul.f32 0.03125, %v128_v25  ;;  %v134_v27 = vmul.f32 %v132_v24, %v132_v24 }
 0x180   :  { %v133_v28 = vsub.f32 %v117_v19, %v131_v26  ;;  %v136_v29 = vsel %vm122_vm1, %v134_v27, 0.0 }
 0x181   :  { %137 = vadd.xlane.f32.xlu1 %v136_v29 }
 0x182   :  { %v135_v30 = vmul.f32 %v133_v28, %v133_v28 }
 0x184   :  { %v139_v31 = vsel %vm122_vm1, %v135_v30, 0.0 }
 0x185   :  { %140 = vadd.xlane.f32.xlu1 %v139_v31 }
 0x20e   :  { %v138_v38 = vpop.xlane.xlu1 %137 }
 0x20f   :  { %v142_v39 = vmul.f32 0.03125, %v138_v38 }
 0x211   :  { %v144_v40 = vadd.f32 1e-12, %v142_v39 }
 0x212   :  { %v141_v41 = vpop.xlane.xlu1 %140 }
 0x213   :  { %4215 = vrsqrt.f32 %v144_v40  ;;  %v143_v42 = vmul.f32 0.03125, %v141_v41 }
 0x215   :  { %v145_v43 = vadd.f32 1e-12, %v143_v42 }
 0x217   :  { %4217 = vrsqrt.f32 %v145_v43 }
 0x21d   :  { %v4216_v44 = vpop.eup %4215 }
 0x21e   :  { %v148_v46 = vmul.f32 %v4216_v44, %v132_v24 }
 0x220   :  { %v154_v48 = vmul.f32 %v3402_v45, %v148_v46 }
 0x221   :  { %v4218_v49 = vpop.eup %4217 }
 0x222   :  { %v149_v50 = vmul.f32 %v4218_v49, %v133_v28  ;;  %v4424_v51 = vadd.f32 %v3403_v47, %v154_v48 }
 0x224   :  { %v155_v52 = vmul.f32 %v3402_v45, %v149_v50  ;;  %3688 = vmatprep.mubr.msk.f32.mxu1 %vm122_vm1, %v4424_v51 }
 0x226   :  { %v4428_v53 = vadd.f32 %v3403_v47, %v155_v52 }
 0x228   :  { %3689 = vmatmul.mubr.msk.f32.vlgmr.msra.gmra.mrb[0].mxu1 %vm122_vm1, %v4428_v53 }
 0x2fb   :  { %v3690_v59 = vpop.f32.mrb[0].mxu1 }
 0x2fc   :  { %v4443_v60 = vadd.f32 %v3690_v59, %v188_v58  ;;  %v261_v61 = vpop.f32.mrb[1].mxu1 }
 0x2fd   :  { %v4445_v62 = vadd.f32 %v261_v61, %v188_v58 }
 0x2ff   :  { %3695 = vmatprep.mubr.msk.f32.mxu1 %vm276_vm2, %v4445_v62  ;;  %v4451_v63 = vpack.i.bf16 %v4443_v60, %v4445_v62 }
 0x301   :  { %4141 = vrot.lane.b32.xlu1 %v4451_v63, %s4313_s14  ;;  %4136 = vrot.lane.b32.xlu0 %v4451_v63, %s4314_s15 }
 0x305   :  { %474 = vrot.lane.b32.xlu1 %v4445_v62, %s4315_s16  ;;  %4146 = vrot.lane.b32.xlu0 %v4451_v63, %s4316_s17 }
 0x309   :  { %476 = vrot.lane.b32.xlu1 %v4443_v60, %s4315_s16  ;;  %842 = vrot.lane.b32.xlu0 %v4443_v60, %s4317_s18 }
 0x30d   :  { %840 = vrot.lane.b32.xlu1 %v4445_v62, %s4317_s18 }
 0x373   :  { %v4142_v0 = vpop.permute.xlu1 %4141  ;;  %v4137_v1 = vpop.permute.xlu0 %4136 }
 0x374   :  { %v4144_v2 = vunpack.i.h.bf16 %v4142_v0  ;;  %v4143_v3 = vunpack.i.l.bf16 %v4142_v0  ;;  %v4139_v4 = vunpack.i.h.bf16 %v4137_v1  ;;  %v4138_v5 = vunpack.i.l.bf16 %v4137_v1 }
 0x376   :  { %v3960_v7 = vpack.c.bf16 %v4139_v4, %v4138_v5  ;;  %v3970_v8 = vpack.c.bf16 %v4144_v2, %v4143_v3 }
 0x377   :  { %v4147_v9 = vpop.permute.xlu0 %4146  ;;  %v475_v10 = vpop.permute.xlu1 %474 }
 0x378   :  { %3962 = vmatprep.subr.msk.bf16.mxu1 %vm4469_vm3, %v3960_v7  ;;  %v4149_v11 = vunpack.i.h.bf16 %v4147_v9  ;;  %v4148_v12 = vunpack.i.l.bf16 %v4147_v9 }
 0x379   :  { %3965 = vmatpush3.bf16.xpose.msk.msra.mxu1 %vm4469_vm3, %v3960_v7 }
 0x37a   :  { %3972 = vmatprep.subr.msk.bf16.mxu1 %vm4469_vm3, %v3970_v8  ;;  %v3980_v13 = vpack.c.bf16 %v4149_v11, %v4148_v12 }
 0x37b   :  { %v477_v14 = vpop.permute.xlu1 %476  ;;  %v843_v16 = vpop.permute.xlu0 %842 }
 0x37f   :  { %v841_v15 = vpop.permute.xlu1 %840 }
 0x380   :  { %3696 = vmatmul.mubr.msk.f32.vlgmr.msra.gmra.mrb[2].mxu1 %vm276_vm2, %v4443_v60 }
 0x381   :  { %3975 = vmatpush3.bf16.xpose.msk.msra.mxu1 %vm4469_vm3, %v3970_v8  ;;  %3709 = vmatprep.mubr.msk.f32.mxu1 %vm276_vm2, %v475_v10 }
 0x382   :  { %3982 = vmatprep.subr.msk.bf16.mxu1 %vm4469_vm3, %v3980_v13 }
 0x388   :  { %3710 = vmatmul.mubr.msk.f32.vlgmr.msra.gmra.mrb[4].mxu1 %vm276_vm2, %v477_v14 }
 0x389   :  { %3985 = vmatpush3.bf16.xpose.msk.msra.mxu1 %vm4469_vm3, %v3980_v13  ;;  %3733 = vmatprep.mubr.msk.f32.mxu1 %vm276_vm2, %v841_v15 }
 0x390   :  { %3734 = vmatmul.mubr.msk.f32.vlgmr.msra.gmra.mrb[6].mxu1 %vm276_vm2, %v843_v16 }
 0x453   :  { %v3697_v17 = vpop.f32.mrb[2].mxu1 }
 0x454   :  { %v361_v19 = vmul.f32 0.35355338, %v3697_v17  ;;  %v351_v20 = vpop.f32.mrb[3].mxu1 }
 0x455   :  { %v360_v22 = vmul.f32 0.35355338, %v351_v20 }
 0x456   :  { %v363_v23 = vadd.f32 %v361_v19, %v4494_v18 }
 0x457   :  { %v362_v24 = vadd.f32 %v360_v22, %v4499_v21 }
 0x458   :  { %v368_v25 = vsel %vm364_vm4, %v363_v23, -inf }
 0x459   :  { %369 = vmax.xlane.f32.xlu0 %v368_v25  ;;  %v365_v26 = vsel %vm364_vm4, %v362_v24, -inf }
 0x45a   :  { %366 = vmax.xlane.f32.xlu1 %v365_v26 }
 0x45b   :  { %v3711_v27 = vpop.f32.mrb[4].mxu1 }
 0x45c   :  { %v556_v28 = vpop.f32.mrb[5].mxu1  ;;  %v566_v29 = vmul.f32 0.35355338, %v3711_v27 }
 0x45d   :  { %v565_v30 = vmul.f32 0.35355338, %v556_v28 }
 0x45e   :  { %v568_v33 = vadd.f32 %v566_v29, %v4494_v18 }
 0x45f   :  { %v567_v31 = vadd.f32 %v565_v30, %v4499_v21 }
 0x460   :  { %v572_v36 = vsel %vm364_vm4, %v568_v33, -inf }
 0x461   :  { %v569_v32 = vsel %vm364_vm4, %v567_v31, -inf }
 0x462   :  { %570 = vmax.xlane.f32.xlu0 %v569_v32 }
 0x463   :  { %v3735_v34 = vpop.f32.mrb[6].mxu1 }
 0x464   :  { %v922_v35 = vpop.f32.mrb[7].mxu1  ;;  %v932_v3 = vmul.f32 0.35355338, %v3735_v34 }
 0x465   :  { %v931_v1 = vmul.f32 0.35355338, %v922_v35 }
 0x466   :  { %573 = vmax.xlane.f32.xlu0 %v572_v36  ;;  %v934_v5 = vadd.f32 %v932_v3, %v4494_v18 }
 0x467   :  { %v933_v2 = vadd.f32 %v931_v1, %v4499_v21 }
 0x468   :  { %v938_v7 = vsel %vm364_vm4, %v934_v5, -inf }
 0x469   :  { %v935_v4 = vsel %vm364_vm4, %v933_v2, -inf }
 0x4e6   :  { %v370_v37 = vpop.xlane.xlu0 %369 }
 0x4e7   :  { %v372_v38 = vsub.f32 %v363_v23, %v370_v37  ;;  %v367_v39 = vpop.xlane.xlu1 %366 }
 0x4e8   :  { %v371_v40 = vsub.f32 %v362_v24, %v367_v39 }
 0x4e9   :  { %v375_v41 = vmul.f32 1.442695, %v372_v38 }
 0x4ea   :  { %v373_v42 = vmul.f32 1.442695, %v371_v40 }
 0x4eb   :  { %4219 = vpow2.f32 %v375_v41 }
 0x4ec   :  { %4221 = vpow2.f32 %v373_v42 }
 0x4ef   :  { %v571_v43 = vpop.xlane.xlu0 %570 }
 0x4f0   :  { %v575_v44 = vsub.f32 %v567_v31, %v571_v43 }
 0x4f2   :  { %v577_v45 = vmul.f32 1.442695, %v575_v44  ;;  %v169_v44 = vld [vmem:[%s4911_s5 + $0x28] sm:$0xff] }
 0x4f3   :  { %v574_v46 = vpop.xlane.xlu0 %573 }
 0x4f4   :  { %4223 = vpow2.f32 %v577_v45  ;;  %v576_v47 = vsub.f32 %v568_v33, %v574_v46  ;;  %v168_v45 = vld [vmem:[%s4911_s5 + $0x20] sm:$0xff] }
 0x4f5   :  { %v4220_v48 = vpop.eup %4219 }
 0x4f6   :  { %v4222_v49 = vpop.eup %4221  ;;  %v579_v50 = vmul.f32 1.442695, %v576_v47  ;;  %v380_v52 = vsel %vm364_vm4, %v4220_v48, 0.0 }
 0x4f7   :  { %381 = vadd.xlane.f32.xlu0 %v380_v52  ;;  %v377_v54 = vsel %vm364_vm4, %v4222_v49, 0.0 }
 0x4f8   :  { %4225 = vpow2.f32 %v579_v50  ;;  %378 = vadd.xlane.f32.xlu1 %v377_v54 }
 0x4fe   :  { %v4224_v58 = vpop.eup %4223 }
 0x4ff   :  { %v581_v59 = vsel %vm364_vm4, %v4224_v58, 0.0 }
 0x500   :  { %582 = vadd.xlane.f32.xlu1 %v581_v59 }
 0x502   :  { %v4226_v61 = vpop.eup %4225 }
 0x503   :  { %v584_v0 = vsel %vm364_vm4, %v4226_v61, 0.0 }
 0x504   :  { %585 = vadd.xlane.f32.xlu0 %v584_v0 }
 0x511   :  { %4151 = vrot.lane.b32.xlu1 %v4451_v63, %s4318_s23 }
 0x515   :  { %4161 = vrot.lane.b32.xlu1 %v4451_v63, %s4319_s24 }
 0x519   :  { %1127 = vrot.lane.b32.xlu1 %v4445_v62, %s4320_s0 }
 0x51a   :  { %4156 = vrot.lane.b32.xlu0 %v4451_v63, %s4321_s1 }
 0x51d   :  { %1129 = vrot.lane.b32.xlu1 %v4443_v60, %s4320_s0 }
 0x539   :  { %936 = vmax.xlane.f32.xlu0 %v935_v4 }
 0x541   :  { %939 = vmax.xlane.f32.xlu1 %v938_v7 }
 0x584   :  { %v382_v8 = vpop.xlane.xlu0 %381 }
 0x585   :  { %v379_v62 = vpop.xlane.xlu1 %378 }
 0x586   :  { %4227 = vrcp.f32 %v379_v62 }
 0x587   :  { %4229 = vrcp.f32 %v382_v8 }
 0x58d   :  { %v583_v9 = vpop.xlane.xlu1 %582 }
 0x58e   :  { %4231 = vrcp.f32 %v583_v9 }
 0x590   :  { %v4228_v10 = vpop.eup %4227 }
 0x591   :  { %v586_v60 = vpop.xlane.xlu0 %585  ;;  %v4152_v11 = vpop.permute.xlu1 %4151  ;;  %v385_v12 = vmul.f32 %v4228_v10, %v4222_v49 }
 0x592   :  { %4233 = vrcp.f32 %v586_v60  ;;  %v4154_v13 = vunpack.i.h.bf16 %v4152_v11  ;;  %v4153_v14 = vunpack.i.l.bf16 %v4152_v11  ;;  %v4230_v16 = vpop.eup %4229  ;;  %v170_v11 = vld [vmem:[%s4911_s5 + $0x30] sm:$0xff] }
 0x593   :  { %3702 = vmatprep.mubr.msk.f32.mxu0 %vm364_vm4, %v385_v12  ;;  %v386_v26 = vmul.f32 %v4230_v16, %v4220_v48 }
 0x594   :  { %v3966_v15 = vpack.c.bf16 %v4154_v13, %v4153_v14 }
 0x595   :  { %v4157_v17 = vpop.permute.xlu0 %4156  ;;  %v4162_v19 = vpop.permute.xlu1 %4161 }
 0x596   :  { %v4159_v20 = vunpack.i.h.bf16 %v4157_v17  ;;  %v4158_v22 = vunpack.i.l.bf16 %v4157_v17  ;;  %v4164_v23 = vunpack.i.h.bf16 %v4162_v19  ;;  %v4163_v24 = vunpack.i.l.bf16 %v4162_v19  ;;  %3967 = vmatprep.subr.bf16.mxu0 %v3966_v15 }
 0x597   :  { %3969 = vmatpush3.bf16.msra.mxu0 %v3966_v15 }
 0x598   :  { %v4232_v25 = vpop.eup %4231  ;;  %v3976_v27 = vpack.c.bf16 %v4159_v20, %v4158_v22  ;;  %v3990_v28 = vpack.c.bf16 %v4164_v23, %v4163_v24 }
 0x599   :  { %v1128_v29 = vpop.permute.xlu1 %1127  ;;  %v589_v30 = vmul.f32 %v4232_v25, %v4224_v58 }
 0x59a   :  { %3703 = vmatmul.mubr.msk.f32.vlgmr.msra.gmra.mrb[2].mxu0 %vm364_vm4, %v386_v26  ;;  %3977 = vmatprep.subr.bf16.mxu0 %v3976_v27 }
 0x59b   :  { %3992 = vmatprep.subr.msk.bf16.mxu1 %vm4469_vm3, %v3990_v28  ;;  %3752 = vmatprep.mubr.msk.f32.mxu1 %vm276_vm2, %v1128_v29 }
 0x59c   :  { %v4234_v31 = vpop.eup %4233  ;;  %3979 = vmatpush3.bf16.msra.mxu0 %v3976_v27  ;;  %3716 = vmatprep.mubr.msk.f32.mxu0 %vm364_vm4, %v589_v30 }
 0x59d   :  { %v590_v32 = vmul.f32 %v4234_v31, %v4226_v61  ;;  %3995 = vmatpush3.bf16.xpose.msk.msra.mxu1 %vm4469_vm3, %v3990_v28  ;;  %v1130_v33 = vpop.permute.xlu1 %1129  ;;  %3719 = vmatprep.subr.mxu0 %v169_v44 }
 0x59f   :  { %3717 = vmatmul.mubr.msk.f32.vlgmr.msra.gmra.mrb[4].mxu0 %vm364_vm4, %v590_v32  ;;  %v171_v32 = vld [vmem:[%s4911_s5 + $0x38] sm:$0xff] }
 0x5a0   :  { %3720 = vmatpush3.msra.mxu0 %v169_v44 }
 0x5a1   :  { %3724 = vmatprep.subr.mxu0 %v168_v45 }
 0x5a4   :  { %3753 = vmatmul.mubr.msk.f32.vlgmr.msra.gmra.mrb[8].mxu1 %vm276_vm2, %v1130_v33 }
 0x5c6   :  { %v937_v34 = vpop.xlane.xlu0 %936 }
 0x5c7   :  { %v941_v35 = vsub.f32 %v933_v2, %v937_v34 }
 0x5c9   :  { %v943_v38 = vmul.f32 1.442695, %v941_v35 }
 0x5ce   :  { %v940_v36 = vpop.xlane.xlu1 %939 }
 0x5cf   :  { %v942_v37 = vsub.f32 %v934_v5, %v940_v36 }
 0x5d1   :  { %v945_v39 = vmul.f32 1.442695, %v942_v37 }
 0x5d3   :  { %4235 = vpow2.f32 %v945_v39 }
 0x5d4   :  { %4237 = vpow2.f32 %v943_v38  ;;  %v1416_v38 = vsub.s32 1, %v4432_v55 }
 0x5d6   :  { %v1417_v39 = vrot.slane %v4438_v57, %v1416_v38 }
 0x5dd   :  { %v4236_v40 = vpop.eup %4235 }
 0x5de   :  { %v950_v41 = vsel %vm364_vm4, %v4236_v40, 0.0  ;;  %v4238_v42 = vpop.eup %4237 }
 0x5df   :  { %951 = vadd.xlane.f32.xlu0 %v950_v41  ;;  %v947_v43 = vsel %vm364_vm4, %v4238_v42, 0.0 }
 0x5e3   :  { %948 = vadd.xlane.f32.xlu0 %v947_v43 }
 0x5f9   :  { %4166 = vrot.lane.b32.xlu0 %v4451_v63, %s4322_s29 }
 0x66c   :  { %v952_v46 = vpop.xlane.xlu0 %951 }
 0x66d   :  { %v3704_v47 = vpop.f32.mrb[2].mxu0 }
 0x66e   :  { %v465_v48 = vpop.f32.mrb[3].mxu0 }
 0x670   :  { %v949_v49 = vpop.xlane.xlu0 %948 }
 0x671   :  { %4239 = vrcp.f32 %v949_v49 }
 0x672   :  { %4241 = vrcp.f32 %v952_v46  ;;  %v3718_v50 = vpop.f32.mrb[4].mxu0 }
 0x673   :  { %v669_v52 = vpop.f32.mrb[5].mxu0 }
 0x674   :  { %v4167_v54 = vpop.permute.xlu0 %4166  ;;  %3721 = vmatprep.mubr.msk.f32.mxu0 %vm276_vm2, %v669_v52 }
 0x675   :  { %v4169_v58 = vunpack.i.h.bf16 %v4167_v54  ;;  %v4168_v59 = vunpack.i.l.bf16 %v4167_v54  ;;  %3722 = vmatmul.mubr.msk.f32.vlgmr.msra.gmra.mrb[6].mxu0 %vm276_vm2, %v3718_v50 }
 0x676   :  { %3726 = vmatprep.mubr.msk.f32.mxu0 %vm276_vm2, %v465_v48  ;;  %3725 = vmatpush3.msra.mxu0 %v168_v45 }
 0x677   :  { %v3986_v61 = vpack.c.bf16 %v4169_v58, %v4168_v59  ;;  %v3754_v0 = vpop.f32.mrb[8].mxu1 }
 0x678   :  { %v1209_v1 = vpop.f32.mrb[9].mxu1  ;;  %v1219_v2 = vmul.f32 0.35355338, %v3754_v0 }
 0x679   :  { %v1218_v3 = vmul.f32 0.35355338, %v1209_v1  ;;  %3987 = vmatprep.subr.bf16.mxu0 %v3986_v61  ;;  %v173_v1 = vld [vmem:[%s4911_s5 + $0x48] sm:$0xff] }
 0x67a   :  { %v1221_v9 = vadd.f32 %v1219_v2, %v4494_v18 }
 0x67b   :  { %v4240_v4 = vpop.eup %4239  ;;  %v1220_v5 = vadd.f32 %v1218_v3, %v4499_v21  ;;  %v174_v3 = vld [vmem:[%s4911_s5 + $0x50] sm:$0xff] }
 0x67c   :  { %v4242_v7 = vpop.eup %4241  ;;  %v955_v62 = vmul.f32 %v4240_v4, %v4238_v42  ;;  %v1225_v60 = vsel %vm364_vm4, %v1221_v9, -inf  ;;  %v175_v4 = vld [vmem:[%s4911_s5 + $0x58] sm:$0xff] }
 0x67d   :  { %v1222_v8 = vsel %vm364_vm4, %v1220_v5, -inf  ;;  %3727 = vmatmul.mubr.msk.f32.vlgmr.msra.gmra.mrb[6].mxu0 %vm276_vm2, %v3704_v47  ;;  %v956_v10 = vmul.f32 %v4242_v7, %v4236_v40 }
 0x67e   :  { %1223 = vmax.xlane.f32.xlu1 %v1222_v8  ;;  %3989 = vmatpush3.bf16.msra.mxu0 %v3986_v61 }
 0x67f   :  { %3740 = vmatprep.mubr.msk.f32.mxu0 %vm364_vm4, %v955_v62  ;;  %3743 = vmatprep.subr.mxu0 %v170_v11 }
 0x681   :  { %3741 = vmatmul.mubr.msk.f32.vlgmr.msra.gmra.mrb[8].mxu0 %vm364_vm4, %v956_v10 }
 0x682   :  { %1226 = vmax.xlane.f32.xlu1 %v1225_v60  ;;  %3744 = vmatpush3.msra.mxu0 %v170_v11  ;;  %v1450_v11 = vsub.s32 4, %v4432_v55 }
 0x70b   :  { %v1224_v12 = vpop.xlane.xlu1 %1223 }
 0x70c   :  { %v1228_v13 = vsub.f32 %v1220_v5, %v1224_v12  ;;  %v4004_v5 = vpack.c.bf16 %v175_v4, %v174_v3  ;;  %v1456_v12 = vsub.s32 5, %v4432_v55  ;;  %v1565_v3 = vsub.s32 3, %v4432_v55 }
 0x70e   :  { %v1230_v16 = vmul.f32 1.442695, %v1228_v13  ;;  %v1451_v13 = vrot.slane %v4438_v57, %v1450_v11  ;;  %v1566_v4 = vrot.slane %v4438_v57, %v1565_v3 }
 0x70f   :  { %v1227_v14 = vpop.xlane.xlu1 %1226 }
 0x710   :  { %v1229_v15 = vsub.f32 %v1221_v9, %v1227_v14 }
 0x712   :  { %v1232_v17 = vmul.f32 1.442695, %v1229_v15 }
 0x714   :  { %4243 = vpow2.f32 %v1232_v17 }
 0x715   :  { %4245 = vpow2.f32 %v1230_v16  ;;  %v1457_v16 = vrot.slane %v4438_v57, %v1456_v12 }
 0x71e   :  { %v4244_v19 = vpop.eup %4243 }
 0x71f   :  { %v1237_v20 = vsel %vm364_vm4, %v4244_v19, 0.0  ;;  %v4246_v22 = vpop.eup %4245 }
 0x720   :  { %1238 = vadd.xlane.f32.xlu1 %v1237_v20  ;;  %v1234_v23 = vsel %vm364_vm4, %v4246_v22, 0.0 }
 0x724   :  { %1235 = vadd.xlane.f32.xlu1 %v1234_v23 }
 0x735   :  { %4171 = vrot.lane.b32.xlu1 %v4451_v63, %s4323_s9 }
 0x754   :  { %v3742_v24 = vpop.f32.mrb[8].mxu0 }
 0x755   :  { %v1035_v25 = vpop.f32.mrb[9].mxu0 }
 0x756   :  { %3745 = vmatprep.mubr.msk.f32.mxu0 %vm276_vm2, %v1035_v25  ;;  %v176_v25 = vld [vmem:[%s4911_s5 + $0x60] sm:$0xff] }
 0x757   :  { %3746 = vmatmul.mubr.msk.f32.vlgmr.msra.gmra.mrb[6].mxu0 %vm276_vm2, %v3742_v24 }
 0x7ad   :  { %v1239_v26 = vpop.xlane.xlu1 %1238 }
 0x7ae   :  { %4247 = vrcp.f32 %v1239_v26  ;;  %v177_v26 = vld [vmem:[%s4911_s5 + $0x68] sm:$0xff] }
 0x7b1   :  { %v1236_v27 = vpop.xlane.xlu1 %1235 }
 0x7b2   :  { %4249 = vrcp.f32 %v1236_v27  ;;  %v4008_v27 = vpack.c.bf16 %v177_v26, %v176_v25 }
 0x7b5   :  { %v4172_v28 = vpop.permute.xlu1 %4171 }
 0x7b6   :  { %v4174_v29 = vunpack.i.h.bf16 %v4172_v28  ;;  %v4173_v30 = vunpack.i.l.bf16 %v4172_v28  ;;  %v178_v28 = vld [vmem:[%s4911_s5 + $0x70] sm:$0xff] }
 0x7b8   :  { %v3996_v31 = vpack.c.bf16 %v4174_v29, %v4173_v30  ;;  %v4248_v63 = vpop.eup %4247  ;;  %v179_v29 = vld [vmem:[%s4911_s5 + $0x78] sm:$0xff]  ;;  %v180_v30 = vld [vmem:[%s4911_s5 + $0x80] sm:$0xff] }
 0x7b9   :  { %v1243_v35 = vmul.f32 %v4248_v63, %v4244_v19 }
 0x7ba   :  { %3997 = vmatprep.subr.bf16.mxu0 %v3996_v31 }
 0x7bb   :  { %3999 = vmatpush3.bf16.msra.mxu0 %v3996_v31  ;;  %v4012_v31 = vpack.c.bf16 %v179_v29, %v178_v28  ;;  %v3444_v29 = vld [vmem:[%s4911_s5 + $0xb0] sm:$0xff] }
 0x7bc   :  { %v4250_v33 = vpop.eup %4249  ;;  %3762 = vmatprep.subr.mxu0 %v171_v32 }
 0x7bd   :  { %v1242_v34 = vmul.f32 %v4250_v33, %v4246_v22  ;;  %v182_v33 = vld [vmem:[%s4911_s5 + $0x90] sm:$0xff] }
 0x7bf   :  { %3759 = vmatprep.mubr.msk.f32.mxu0 %vm364_vm4, %v1242_v34  ;;  %v183_v34 = vld [vmem:[%s4911_s5 + $0x98] sm:$0xff] }
 0x7c0   :  { %3760 = vmatmul.mubr.msk.f32.vlgmr.msra.gmra.mrb[10].mxu0 %vm364_vm4, %v1243_v35  ;;  %v4020_v35 = vpack.c.bf16 %v183_v34, %v182_v33 }
 0x7c1   :  { %3763 = vmatpush3.msra.mxu0 %v171_v32  ;;  %v181_v32 = vld [vmem:[%s4911_s5 + $0x88] sm:$0xff] }
 0x7c2   :  { %4009 = vmatprep.subr.bf16.mxu0 %v4008_v27  ;;  %v4016_v63 = vpack.c.bf16 %v181_v32, %v180_v30  ;;  %v3445_v30 = vld [vmem:[%s4911_s5 + $0xb8] sm:$0xff] }
 0x893   :  { %v3761_v36 = vpop.f32.mrb[10].mxu0 }
 0x894   :  { %v1322_v37 = vpop.f32.mrb[11].mxu0 }
 0x895   :  { %3764 = vmatprep.mubr.msk.f32.mxu0 %vm276_vm2, %v1322_v37 }
 0x896   :  { %3765 = vmatmul.mubr.msk.f32.vlgmr.msra.gmra.mrb[6].mxu0 %vm276_vm2, %v3761_v36  ;;  %v1462_v36 = vsub.s32 2, %v4432_v55 }
 0x897   :  { %4011 = vmatpush3.bf16.msra.mxu0 %v4008_v27  ;;  %v3443_v27 = vld [vmem:[%s4911_s5 + $0xa8] sm:$0xff] }
 0x898   :  { %4013 = vmatprep.subr.bf16.mxu0 %v4012_v31  ;;  %v1463_v37 = vrot.slane %v4438_v57, %v1462_v36 }
 0x89b   :  { %4015 = vmatpush3.bf16.msra.mxu0 %v4012_v31  ;;  %v4028_v31 = vpack.c.bf16 %v3445_v30, %v3444_v29 }
 0x89c   :  { %4017 = vmatprep.subr.bf16.mxu0 %v4016_v63 }
 0x89f   :  { %4019 = vmatpush3.bf16.msra.mxu0 %v4016_v63 }
 0x8a0   :  { %4021 = vmatprep.subr.bf16.mxu0 %v4020_v35 }
 0x8a3   :  { %4023 = vmatpush3.bf16.msra.mxu0 %v4020_v35 }
 0x969   :  { %v3766_v40 = vpop.f32.mrb[6].mxu0 }
 0x96a   :  { %v1419_v41 = vadd.f32 %v3766_v40, %v1417_v39  ;;  %v1403_v42 = vpop.f32.mrb[7].mxu0 }
 0x96b   :  { %v1418_v43 = vadd.f32 %v1417_v39, %v1403_v42 }
 0x96c   :  { %v1421_v44 = vadd.f32 %v1419_v41, %v4428_v53 }
 0x96d   :  { %v1420_v45 = vadd.f32 %v1418_v43, %v4424_v51  ;;  %v172_v51 = vld [vmem:[%s4911_s5 + $0x40] sm:$0xff] }
 0x96e   :  { %v1425_v46 = vsel %vm122_vm1, %v1421_v44, 0.0  ;;  %v4000_v2 = vpack.c.bf16 %v173_v1, %v172_v51 }
 0x96f   :  { %1426 = vadd.xlane.f32.xlu1 %v1425_v46  ;;  %v1422_v47 = vsel %vm122_vm1, %v1420_v45, 0.0 }
 0x970   :  { %1423 = vadd.xlane.f32.xlu0 %v1422_v47  ;;  %4001 = vmatprep.subr.bf16.mxu1 %v4000_v2 }
 0x971   :  { %4003 = vmatpush3.bf16.msra.mxu1 %v4000_v2 }
 0x972   :  { %4005 = vmatprep.subr.bf16.mxu1 %v4004_v5 }
 0x975   :  { %4007 = vmatpush3.bf16.msra.mxu1 %v4004_v5 }
 0x9fc   :  { %v1427_v48 = vpop.xlane.xlu1 %1426 }
 0x9fd   :  { %v1429_v49 = vmul.f32 0.03125, %v1427_v48  ;;  %v1424_v50 = vpop.xlane.xlu0 %1423 }
 0x9fe   :  { %v1428_v52 = vmul.f32 0.03125, %v1424_v50 }
 0x9ff   :  { %v1431_v54 = vsub.f32 %v1421_v44, %v1429_v49 }
 0xa00   :  { %v1430_v58 = vsub.f32 %v1420_v45, %v1428_v52 }
 0xa01   :  { %v1433_v0 = vmul.f32 %v1431_v54, %v1431_v54 }
 0xa02   :  { %v1432_v59 = vmul.f32 %v1430_v58, %v1430_v58 }
 0xa03   :  { %v1437_v53 = vsel %vm122_vm1, %v1433_v0, 0.0 }
 0xa04   :  { %v1434_v61 = vsel %vm122_vm1, %v1432_v59, 0.0 }
 0xa05   :  { %1435 = vadd.xlane.f32.xlu0 %v1434_v61 }
 0xa09   :  { %1438 = vadd.xlane.f32.xlu0 %v1437_v53 }
 0xa92   :  { %v1436_v7 = vpop.xlane.xlu0 %1435 }
 0xa93   :  { %v1440_v62 = vmul.f32 0.03125, %v1436_v7 }
 0xa95   :  { %v1442_v8 = vadd.f32 1e-12, %v1440_v62 }
 0xa96   :  { %v1439_v9 = vpop.xlane.xlu0 %1438 }
 0xa97   :  { %4251 = vrsqrt.f32 %v1442_v8  ;;  %v1441_v10 = vmul.f32 0.03125, %v1439_v9 }
 0xa99   :  { %v1443_v60 = vadd.f32 1e-12, %v1441_v10 }
 0xa9b   :  { %4253 = vrsqrt.f32 %v1443_v60 }
 0xaa1   :  { %v4252_v14 = vpop.eup %4251 }
 0xaa2   :  { %v1446_v15 = vmul.f32 %v4252_v14, %v1430_v58 }
 0xaa4   :  { %v1452_v17 = vmul.f32 %v1451_v13, %v1446_v15 }
 0xaa5   :  { %v4254_v19 = vpop.eup %4253 }
 0xaa6   :  { %v1447_v20 = vmul.f32 %v4254_v19, %v1431_v54  ;;  %v1458_v22 = vadd.f32 %v1457_v16, %v1452_v17 }
 0xaa8   :  { %v1453_v23 = vmul.f32 %v1451_v13, %v1447_v20  ;;  %3775 = vmatprep.mubr.msk.f32.mxu1 %vm122_vm1, %v1458_v22 }
 0xaaa   :  { %v1459_v24 = vadd.f32 %v1457_v16, %v1453_v23 }
 0xaac   :  { %3776 = vmatmul.mubr.msk.f32.vlgmr.msra.gmra.mrb[10].mxu1 %vm122_vm1, %v1459_v24 }
 0xb7f   :  { %v3777_v39 = vpop.f32.mrb[10].mxu1 }
 0xb80   :  { %v1542_v40 = vadd.f32 %v3777_v39, %v1463_v37  ;;  %v1536_v41 = vpop.f32.mrb[11].mxu1  ;;  %v1678_v39 = vsub.s32 6, %v4432_v55 }
 0xb81   :  { %v1537_v42 = vadd.f32 %v1536_v41, %v1463_v37 }
 0xb82   :  { %v1548_v43 = vmul.f32 0.044715, %v1542_v40  ;;  %v1546_v51 = vmul.f32 0.5, %v1542_v40  ;;  %v1679_v41 = vrot.slane %v4438_v57, %v1678_v39 }
 0xb83   :  { %v1547_v44 = vmul.f32 0.044715, %v1537_v42  ;;  %v1545_v0 = vmul.f32 0.5, %v1537_v42 }
 0xb84   :  { %v1550_v45 = vmul.f32 %v1548_v43, %v1542_v40 }
 0xb85   :  { %v1549_v46 = vmul.f32 %v1547_v44, %v1537_v42 }
 0xb86   :  { %v1552_v47 = vmul.f32 %v1550_v45, %v1542_v40 }
 0xb87   :  { %v1551_v48 = vmul.f32 %v1549_v46, %v1537_v42 }
 0xb88   :  { %v1554_v49 = vadd.f32 %v1552_v47, %v1542_v40  ;;  %v1684_v40 = vsub.s32 7, %v4432_v55  ;;  %v3305_v55 = vld [vmem:[%s4914_s4 + $0x8] sm:$0xff] }
 0xb89   :  { %v1553_v50 = vadd.f32 %v1551_v48, %v1537_v42 }
 0xb8a   :  { %v1556_v52 = vmul.f32 0.7978846, %v1554_v49  ;;  %v1685_v44 = vrot.slane %v4438_v57, %v1684_v40 }
 0xb8b   :  { %v1555_v54 = vmul.f32 0.7978846, %v1553_v50 }
 0xb8c   :  { %4255 = vtanh.f32 %v1556_v52  ;;  %v4674_v52 = vld [vmem:[%s4912_s6 + $0x8] sm:$0xff] }
 0xb8d   :  { %4257 = vtanh.f32 %v1555_v54  ;;  %v1714_v57 = vrot.slane %v4674_v52, %v187_v56 }
 0xb96   :  { %v4256_v58 = vpop.eup %4255 }
 0xb97   :  { %v4258_v59 = vpop.eup %4257  ;;  %v1560_v61 = vadd.f32 1.0, %v4256_v58 }
 0xb98   :  { %v1559_v53 = vadd.f32 1.0, %v4258_v59 }
 0xb99   :  { %v1562_v2 = vmul.f32 %v1560_v61, %v1546_v51 }
 0xb9a   :  { %v1561_v1 = vmul.f32 %v1559_v53, %v1545_v0 }
 0xb9c   :  { %3794 = vmatprep.mubr.msk.f32.mxu0 %vm38_vm0, %v1561_v1 }
 0xb9d   :  { %3795 = vmatmul.mubr.msk.f32.vlgmr.msra.gmra.mrb[12].mxu0 %vm38_vm0, %v1562_v2 }
 0xc70   :  { %v3796_v5 = vpop.f32.mrb[12].mxu0 }
 0xc71   :  { %v1639_v7 = vpop.f32.mrb[13].mxu0  ;;  %v1645_v62 = vadd.f32 %v3796_v5, %v1566_v4 }
 0xc72   :  { %v1640_v8 = vadd.f32 %v1639_v7, %v1566_v4 }
 0xc73   :  { %v1649_v60 = vadd.f32 %v1645_v62, %v1459_v24  ;;  %v3442_v24 = vld [vmem:[%s4911_s5 + $0xa0] sm:$0xff] }
 0xc74   :  { %v1648_v9 = vadd.f32 %v1640_v8, %v1458_v22  ;;  %v4024_v28 = vpack.c.bf16 %v3443_v27, %v3442_v24 }
 0xc75   :  { %v1653_v13 = vsel %vm122_vm1, %v1649_v60, 0.0 }
 0xc76   :  { %v1650_v10 = vsel %vm122_vm1, %v1648_v9, 0.0  ;;  %4025 = vmatprep.subr.bf16.mxu1 %v4024_v28 }
 0xc77   :  { %1651 = vadd.xlane.f32.xlu0 %v1650_v10  ;;  %4027 = vmatpush3.bf16.msra.mxu1 %v4024_v28 }
 0xc78   :  { %4029 = vmatprep.subr.bf16.mxu1 %v4028_v31 }
 0xc7b   :  { %1654 = vadd.xlane.f32.xlu0 %v1653_v13  ;;  %4031 = vmatpush3.bf16.msra.mxu1 %v4028_v31 }
 0xd04   :  { %v1652_v14 = vpop.xlane.xlu0 %1651 }
 0xd05   :  { %v1656_v15 = vmul.f32 0.03125, %v1652_v14 }
 0xd07   :  { %v1658_v16 = vsub.f32 %v1648_v9, %v1656_v15 }
 0xd08   :  { %v1655_v17 = vpop.xlane.xlu0 %1654 }
 0xd09   :  { %v1657_v19 = vmul.f32 0.03125, %v1655_v17  ;;  %v1660_v20 = vmul.f32 %v1658_v16, %v1658_v16 }
 0xd0b   :  { %v1659_v23 = vsub.f32 %v1649_v60, %v1657_v19  ;;  %v1662_v25 = vsel %vm122_vm1, %v1660_v20, 0.0 }
 0xd0c   :  { %1663 = vadd.xlane.f32.xlu0 %v1662_v25 }
 0xd0d   :  { %v1661_v26 = vmul.f32 %v1659_v23, %v1659_v23 }
 0xd0f   :  { %v1665_v22 = vsel %vm122_vm1, %v1661_v26, 0.0 }
 0xd10   :  { %1666 = vadd.xlane.f32.xlu1 %v1665_v22 }
 0xd99   :  { %v1664_v32 = vpop.xlane.xlu0 %1663 }
 0xd9a   :  { %v1668_v63 = vmul.f32 0.03125, %v1664_v32 }
 0xd9c   :  { %v1670_v33 = vadd.f32 1e-12, %v1668_v63 }
 0xd9d   :  { %v1667_v34 = vpop.xlane.xlu1 %1666 }
 0xd9e   :  { %4259 = vrsqrt.f32 %v1670_v33  ;;  %v1669_v35 = vmul.f32 0.03125, %v1667_v34 }
 0xda0   :  { %v1671_v37 = vadd.f32 1e-12, %v1669_v35 }
 0xda2   :  { %4261 = vrsqrt.f32 %v1671_v37 }
 0xda8   :  { %v4260_v42 = vpop.eup %4259 }
 0xda9   :  { %v1674_v43 = vmul.f32 %v4260_v42, %v1658_v16 }
 0xdab   :  { %v1680_v45 = vmul.f32 %v1679_v41, %v1674_v43 }
 0xdac   :  { %v4262_v46 = vpop.eup %4261 }
 0xdad   :  { %v1675_v47 = vmul.f32 %v4262_v46, %v1659_v23  ;;  %v4663_v48 = vadd.f32 %v1685_v44, %v1680_v45 }
 0xdaf   :  { %v1681_v49 = vmul.f32 %v1679_v41, %v1675_v47  ;;  %3805 = vmatprep.mubr.msk.f32.mxu1 %vm122_vm1, %v4663_v48 }
 0xdb1   :  { %v4667_v50 = vadd.f32 %v1685_v44, %v1681_v49 }
 0xdb3   :  { %3806 = vmatmul.mubr.msk.f32.vlgmr.msra.gmra.mrb[12].mxu1 %vm122_vm1, %v4667_v50 }
 0xe86   :  { %v3807_v54 = vpop.f32.mrb[12].mxu1 }
 0xe87   :  { %v4679_v58 = vadd.f32 %v3807_v54, %v1714_v57  ;;  %v1787_v59 = vpop.f32.mrb[13].mxu1 }
 0xe88   :  { %v4681_v61 = vadd.f32 %v1787_v59, %v1714_v57 }
 0xe8a   :  { %3812 = vmatprep.mubr.msk.f32.mxu1 %vm276_vm2, %v4681_v61  ;;  %v4687_v0 = vpack.i.bf16 %v4679_v58, %v4681_v61 }
 0xe8c   :  { %4181 = vrot.lane.b32.xlu1 %v4687_v0, %s4313_s14  ;;  %4176 = vrot.lane.b32.xlu0 %v4687_v0, %s4314_s15 }
 0xe90   :  { %1998 = vrot.lane.b32.xlu1 %v4681_v61, %s4315_s16  ;;  %4186 = vrot.lane.b32.xlu0 %v4687_v0, %s4316_s17 }
 0xe94   :  { %2000 = vrot.lane.b32.xlu1 %v4679_v58, %s4315_s16  ;;  %2366 = vrot.lane.b32.xlu0 %v4679_v58, %s4317_s18 }
 0xe98   :  { %2364 = vrot.lane.b32.xlu1 %v4681_v61, %s4317_s18 }
 0xefe   :  { %v4182_v56 = vpop.permute.xlu1 %4181  ;;  %v4177_v53 = vpop.permute.xlu0 %4176 }
 0xeff   :  { %v4184_v51 = vunpack.i.h.bf16 %v4182_v56  ;;  %v4183_v1 = vunpack.i.l.bf16 %v4182_v56  ;;  %v4179_v2 = vunpack.i.h.bf16 %v4177_v53  ;;  %v4178_v4 = vunpack.i.l.bf16 %v4177_v53 }
 0xf01   :  { %v4032_v5 = vpack.c.bf16 %v4179_v2, %v4178_v4  ;;  %v4042_v7 = vpack.c.bf16 %v4184_v51, %v4183_v1 }
 0xf02   :  { %v4187_v62 = vpop.permute.xlu0 %4186  ;;  %v1999_v8 = vpop.permute.xlu1 %1998 }
 0xf03   :  { %4034 = vmatprep.subr.msk.bf16.mxu1 %vm4469_vm3, %v4032_v5  ;;  %v4189_v9 = vunpack.i.h.bf16 %v4187_v62  ;;  %v4188_v10 = vunpack.i.l.bf16 %v4187_v62 }
 0xf04   :  { %4037 = vmatpush3.bf16.xpose.msk.msra.mxu1 %vm4469_vm3, %v4032_v5 }
 0xf05   :  { %4044 = vmatprep.subr.msk.bf16.mxu1 %vm4469_vm3, %v4042_v7  ;;  %v4052_v60 = vpack.c.bf16 %v4189_v9, %v4188_v10 }
 0xf06   :  { %v2001_v13 = vpop.permute.xlu1 %2000  ;;  %v2367_v15 = vpop.permute.xlu0 %2366 }
 0xf0a   :  { %v2365_v14 = vpop.permute.xlu1 %2364 }
 0xf0b   :  { %3813 = vmatmul.mubr.msk.f32.vlgmr.msra.gmra.mrb[14].mxu1 %vm276_vm2, %v4679_v58 }
 0xf0c   :  { %4047 = vmatpush3.bf16.xpose.msk.msra.mxu1 %vm4469_vm3, %v4042_v7  ;;  %3826 = vmatprep.mubr.msk.f32.mxu1 %vm276_vm2, %v1999_v8 }
 0xf0d   :  { %4054 = vmatprep.subr.msk.bf16.mxu1 %vm4469_vm3, %v4052_v60 }
 0xf13   :  { %3827 = vmatmul.mubr.msk.f32.vlgmr.msra.gmra.mrb[16].mxu1 %vm276_vm2, %v2001_v13 }
 0xf14   :  { %4057 = vmatpush3.bf16.xpose.msk.msra.mxu1 %vm4469_vm3, %v4052_v60  ;;  %3850 = vmatprep.mubr.msk.f32.mxu1 %vm276_vm2, %v2365_v14 }
 0xf1b   :  { %3851 = vmatmul.mubr.msk.f32.vlgmr.msra.gmra.mrb[18].mxu1 %vm276_vm2, %v2367_v15 }
 0xfde   :  { %v3814_v16 = vpop.f32.mrb[14].mxu1 }
 0xfdf   :  { %v1886_v17 = vmul.f32 0.35355338, %v3814_v16  ;;  %v1876_v19 = vpop.f32.mrb[15].mxu1 }
 0xfe0   :  { %v1885_v20 = vmul.f32 0.35355338, %v1876_v19 }
 0xfe1   :  { %v1888_v23 = vadd.f32 %v1886_v17, %v4494_v18 }
 0xfe2   :  { %v1887_v25 = vadd.f32 %v1885_v20, %v4499_v21 }
 0xfe3   :  { %v1892_v26 = vsel %vm364_vm4, %v1888_v23, -inf }
 0xfe4   :  { %1893 = vmax.xlane.f32.xlu0 %v1892_v26  ;;  %v1889_v22 = vsel %vm364_vm4, %v1887_v25, -inf }
 0xfe5   :  { %1890 = vmax.xlane.f32.xlu1 %v1889_v22 }
 0xfe6   :  { %v3828_v24 = vpop.f32.mrb[16].mxu1 }
 0xfe7   :  { %v2080_v27 = vpop.f32.mrb[17].mxu1  ;;  %v2090_v28 = vmul.f32 0.35355338, %v3828_v24 }
 0xfe8   :  { %v2089_v29 = vmul.f32 0.35355338, %v2080_v27 }
 0xfe9   :  { %v2092_v32 = vadd.f32 %v2090_v28, %v4494_v18 }
 0xfea   :  { %v2091_v30 = vadd.f32 %v2089_v29, %v4499_v21 }
 0xfeb   :  { %v2096_v34 = vsel %vm364_vm4, %v2092_v32, -inf }
 0xfec   :  { %v2093_v31 = vsel %vm364_vm4, %v2091_v30, -inf }
 0xfed   :  { %2094 = vmax.xlane.f32.xlu0 %v2093_v31 }
 0xfee   :  { %v3852_v63 = vpop.f32.mrb[18].mxu1 }
 0xfef   :  { %v2446_v33 = vpop.f32.mrb[19].mxu1  ;;  %v2456_v8 = vmul.f32 0.35355338, %v3852_v63 }
 0xff0   :  { %v2455_v7 = vmul.f32 0.35355338, %v2446_v33 }
 0xff1   :  { %2097 = vmax.xlane.f32.xlu0 %v2096_v34  ;;  %v2458_v10 = vadd.f32 %v2456_v8, %v4494_v18 }
 0xff2   :  { %v2457_v62 = vadd.f32 %v2455_v7, %v4499_v21 }
 0xff3   :  { %v2462_v60 = vsel %vm364_vm4, %v2458_v10, -inf }
 0xff4   :  { %v2459_v9 = vsel %vm364_vm4, %v2457_v62, -inf }
0x1071   :  { %v1894_v35 = vpop.xlane.xlu0 %1893 }
0x1072   :  { %v1896_v37 = vsub.f32 %v1888_v23, %v1894_v35  ;;  %v1891_v41 = vpop.xlane.xlu1 %1890 }
0x1073   :  { %v1895_v42 = vsub.f32 %v1887_v25, %v1891_v41 }
0x1074   :  { %v1899_v43 = vmul.f32 1.442695, %v1896_v37 }
0x1075   :  { %v1897_v44 = vmul.f32 1.442695, %v1895_v42 }
0x1076   :  { %4263 = vpow2.f32 %v1899_v43 }
0x1077   :  { %4265 = vpow2.f32 %v1897_v44 }
0x107a   :  { %v2095_v45 = vpop.xlane.xlu0 %2094 }
0x107b   :  { %v2099_v46 = vsub.f32 %v2091_v30, %v2095_v45 }
0x107d   :  { %v2101_v47 = vmul.f32 1.442695, %v2099_v46 }
0x107e   :  { %v2098_v49 = vpop.xlane.xlu0 %2097 }
0x107f   :  { %4267 = vpow2.f32 %v2101_v47  ;;  %v2100_v57 = vsub.f32 %v2092_v32, %v2098_v49 }
0x1080   :  { %v4264_v54 = vpop.eup %4263 }
0x1081   :  { %v4266_v59 = vpop.eup %4265  ;;  %v2103_v56 = vmul.f32 1.442695, %v2100_v57  ;;  %v1904_v53 = vsel %vm364_vm4, %v4264_v54, 0.0  ;;  %v3447_v57 = vld [vmem:[%s4911_s5 + $0xc8] sm:$0xff] }
0x1082   :  { %1905 = vadd.xlane.f32.xlu0 %v1904_v53  ;;  %v1901_v51 = vsel %vm364_vm4, %v4266_v59, 0.0 }
0x1083   :  { %4269 = vpow2.f32 %v2103_v56  ;;  %1902 = vadd.xlane.f32.xlu1 %v1901_v51 }
0x1089   :  { %v4268_v1 = vpop.eup %4267 }
0x108a   :  { %v2105_v2 = vsel %vm364_vm4, %v4268_v1, 0.0 }
0x108b   :  { %2106 = vadd.xlane.f32.xlu1 %v2105_v2 }
0x108d   :  { %v4270_v4 = vpop.eup %4269 }
0x108e   :  { %v2108_v5 = vsel %vm364_vm4, %v4270_v4, 0.0 }
0x108f   :  { %2109 = vadd.xlane.f32.xlu0 %v2108_v5 }
0x109c   :  { %4191 = vrot.lane.b32.xlu1 %v4687_v0, %s4318_s23 }
0x10a0   :  { %4201 = vrot.lane.b32.xlu1 %v4687_v0, %s4319_s24 }
0x10a4   :  { %2651 = vrot.lane.b32.xlu1 %v4681_v61, %s4320_s0 }
0x10a5   :  { %4196 = vrot.lane.b32.xlu0 %v4687_v0, %s4321_s1 }
0x10a8   :  { %2653 = vrot.lane.b32.xlu1 %v4679_v58, %s4320_s0 }
0x10c4   :  { %2460 = vmax.xlane.f32.xlu0 %v2459_v9 }
0x10cc   :  { %2463 = vmax.xlane.f32.xlu1 %v2462_v60 }
0x110f   :  { %v1906_v61 = vpop.xlane.xlu0 %1905 }
0x1110   :  { %v1903_v13 = vpop.xlane.xlu1 %1902 }
0x1111   :  { %4271 = vrcp.f32 %v1903_v13 }
0x1112   :  { %4273 = vrcp.f32 %v1906_v61  ;;  %v4311_v61 = vld [vmem:[%s4913_s2] sm:$0xff] }
0x1118   :  { %v2107_v14 = vpop.xlane.xlu1 %2106 }
0x1119   :  { %4275 = vrcp.f32 %v2107_v14 }
0x111b   :  { %v4272_v15 = vpop.eup %4271 }
0x111c   :  { %v2110_v58 = vpop.xlane.xlu0 %2109  ;;  %v4192_v16 = vpop.permute.xlu1 %4191  ;;  %v1909_v17 = vmul.f32 %v4272_v15, %v4266_v59 }
0x111d   :  { %4277 = vrcp.f32 %v2110_v58  ;;  %v4194_v21 = vunpack.i.h.bf16 %v4192_v16  ;;  %v4193_v19 = vunpack.i.l.bf16 %v4192_v16  ;;  %v4274_v18 = vpop.eup %4273 }
0x111e   :  { %3819 = vmatprep.mubr.msk.f32.mxu0 %vm364_vm4, %v1909_v17  ;;  %v1910_v29 = vmul.f32 %v4274_v18, %v4264_v54  ;;  %v3446_v54 = vld [vmem:[%s4911_s5 + $0xc0] sm:$0xff]  ;;  %v4312_v17 = vld [vmem:[%s4913_s2 + $0x8] sm:$0xff]  ;;  %v3448_v18 = vld [vmem:[%s4911_s5 + $0xd0] sm:$0xff] }
0x111f   :  { %v4038_v20 = vpack.c.bf16 %v4194_v21, %v4193_v19 }
0x1120   :  { %v4197_v23 = vpop.permute.xlu0 %4196  ;;  %v4202_v25 = vpop.permute.xlu1 %4201 }
0x1121   :  { %v4199_v26 = vunpack.i.h.bf16 %v4197_v23  ;;  %v4198_v22 = vunpack.i.l.bf16 %v4197_v23  ;;  %v4204_v24 = vunpack.i.h.bf16 %v4202_v25  ;;  %v4203_v27 = vunpack.i.l.bf16 %v4202_v25  ;;  %4039 = vmatprep.subr.bf16.mxu0 %v4038_v20 }
0x1122   :  { %4041 = vmatpush3.bf16.msra.mxu0 %v4038_v20 }
0x1123   :  { %v4276_v28 = vpop.eup %4275  ;;  %v4048_v30 = vpack.c.bf16 %v4199_v26, %v4198_v22  ;;  %v4062_v31 = vpack.c.bf16 %v4204_v24, %v4203_v27 }
0x1124   :  { %v2652_v32 = vpop.permute.xlu1 %2651  ;;  %v2113_v63 = vmul.f32 %v4276_v28, %v4268_v1 }
0x1125   :  { %3820 = vmatmul.mubr.msk.f32.vlgmr.msra.gmra.mrb[14].mxu0 %vm364_vm4, %v1910_v29  ;;  %4049 = vmatprep.subr.bf16.mxu0 %v4048_v30 }
0x1126   :  { %4064 = vmatprep.subr.msk.bf16.mxu1 %vm4469_vm3, %v4062_v31  ;;  %3869 = vmatprep.mubr.msk.f32.mxu1 %vm276_vm2, %v2652_v32 }
0x1127   :  { %v4278_v33 = vpop.eup %4277  ;;  %4051 = vmatpush3.bf16.msra.mxu0 %v4048_v30  ;;  %3833 = vmatprep.mubr.msk.f32.mxu0 %vm364_vm4, %v2113_v63 }
0x1128   :  { %v2114_v34 = vmul.f32 %v4278_v33, %v4270_v4  ;;  %4067 = vmatpush3.bf16.xpose.msk.msra.mxu1 %vm4469_vm3, %v4062_v31  ;;  %v2654_v35 = vpop.permute.xlu1 %2653  ;;  %3836 = vmatprep.subr.mxu0 %v3447_v57 }
0x112a   :  { %3834 = vmatmul.mubr.msk.f32.vlgmr.msra.gmra.mrb[16].mxu0 %vm364_vm4, %v2114_v34 }
0x112b   :  { %3837 = vmatpush3.msra.mxu0 %v3447_v57 }
0x112c   :  { %3841 = vmatprep.subr.mxu0 %v3446_v54 }
0x112f   :  { %3870 = vmatmul.mubr.msk.f32.vlgmr.msra.gmra.mrb[20].mxu1 %vm276_vm2, %v2654_v35 }
0x1151   :  { %v2461_v37 = vpop.xlane.xlu0 %2460 }
0x1152   :  { %v2465_v41 = vsub.f32 %v2457_v62, %v2461_v37 }
0x1154   :  { %v2467_v44 = vmul.f32 1.442695, %v2465_v41 }
0x1159   :  { %v2464_v42 = vpop.xlane.xlu1 %2463 }
0x115a   :  { %v2466_v43 = vsub.f32 %v2458_v10, %v2464_v42 }
0x115c   :  { %v2469_v45 = vmul.f32 1.442695, %v2466_v43  ;;  %v3449_v43 = vld [vmem:[%s4911_s5 + $0xd8] sm:$0xff] }
0x115e   :  { %4279 = vpow2.f32 %v2469_v45 }
0x115f   :  { %4281 = vpow2.f32 %v2467_v44 }
0x1168   :  { %v4280_v46 = vpop.eup %4279 }
0x1169   :  { %v2474_v47 = vsel %vm364_vm4, %v4280_v46, 0.0  ;;  %v4282_v49 = vpop.eup %4281 }
0x116a   :  { %2475 = vadd.xlane.f32.xlu0 %v2474_v47  ;;  %v2471_v6 = vsel %vm364_vm4, %v4282_v49, 0.0 }
0x116e   :  { %2472 = vadd.xlane.f32.xlu0 %v2471_v6  ;;  %v2941_v6 = vrot.slane %v4674_v52, %v1416_v38 }
0x1184   :  { %4206 = vrot.lane.b32.xlu0 %v4687_v0, %s4322_s29 }
0x11f7   :  { %v2476_v59 = vpop.xlane.xlu0 %2475 }
0x11f8   :  { %v3821_v56 = vpop.f32.mrb[14].mxu0 }
0x11f9   :  { %v1989_v53 = vpop.f32.mrb[15].mxu0 }
0x11fb   :  { %v2473_v51 = vpop.xlane.xlu0 %2472 }
0x11fc   :  { %4283 = vrcp.f32 %v2473_v51 }
0x11fd   :  { %4285 = vrcp.f32 %v2476_v59  ;;  %v3835_v1 = vpop.f32.mrb[16].mxu0 }
0x11fe   :  { %v2193_v2 = vpop.f32.mrb[17].mxu0 }
0x11ff   :  { %v4207_v4 = vpop.permute.xlu0 %4206  ;;  %3838 = vmatprep.mubr.msk.f32.mxu0 %vm276_vm2, %v2193_v2 }
0x1200   :  { %v4209_v5 = vunpack.i.h.bf16 %v4207_v4  ;;  %v4208_v7 = vunpack.i.l.bf16 %v4207_v4  ;;  %3839 = vmatmul.mubr.msk.f32.vlgmr.msra.gmra.mrb[18].mxu0 %vm276_vm2, %v3835_v1 }
0x1201   :  { %3843 = vmatprep.mubr.msk.f32.mxu0 %vm276_vm2, %v1989_v53  ;;  %3842 = vmatpush3.msra.mxu0 %v3446_v54 }
0x1202   :  { %v4058_v62 = vpack.c.bf16 %v4209_v5, %v4208_v7  ;;  %v3871_v8 = vpop.f32.mrb[20].mxu1 }
0x1203   :  { %v2733_v9 = vpop.f32.mrb[21].mxu1  ;;  %v2743_v10 = vmul.f32 0.35355338, %v3871_v8 }
0x1204   :  { %v2742_v60 = vmul.f32 0.35355338, %v2733_v9  ;;  %4059 = vmatprep.subr.bf16.mxu0 %v4058_v62 }
0x1205   :  { %v2745_v21 = vadd.f32 %v4312_v17, %v2743_v10 }
0x1206   :  { %v4284_v13 = vpop.eup %4283  ;;  %v2744_v14 = vadd.f32 %v4311_v61, %v2742_v60 }
0x1207   :  { %v4286_v15 = vpop.eup %4285  ;;  %v2479_v58 = vmul.f32 %v4284_v13, %v4282_v49  ;;  %v2749_v20 = vsel %vm364_vm4, %v2745_v21, -inf  ;;  %v3451_v13 = vld [vmem:[%s4911_s5 + $0xe8] sm:$0xff] }
0x1208   :  { %v2746_v16 = vsel %vm364_vm4, %v2744_v14, -inf  ;;  %3844 = vmatmul.mubr.msk.f32.vlgmr.msra.gmra.mrb[18].mxu0 %vm276_vm2, %v3821_v56  ;;  %v2480_v19 = vmul.f32 %v4286_v15, %v4280_v46  ;;  %v3453_v15 = vld [vmem:[%s4911_s5 + $0xf8] sm:$0xff] }
0x1209   :  { %2747 = vmax.xlane.f32.xlu1 %v2746_v16  ;;  %4061 = vmatpush3.bf16.msra.mxu0 %v4058_v62 }
0x120a   :  { %3857 = vmatprep.mubr.msk.f32.mxu0 %vm364_vm4, %v2479_v58  ;;  %3860 = vmatprep.subr.mxu0 %v3448_v18 }
0x120c   :  { %3858 = vmatmul.mubr.msk.f32.vlgmr.msra.gmra.mrb[20].mxu0 %vm364_vm4, %v2480_v19 }
0x120d   :  { %2750 = vmax.xlane.f32.xlu1 %v2749_v20  ;;  %3861 = vmatpush3.msra.mxu0 %v3448_v18 }
0x1296   :  { %v2748_v23 = vpop.xlane.xlu1 %2747 }
0x1297   :  { %v2752_v25 = vsub.f32 %v2744_v14, %v2748_v23  ;;  %v3452_v14 = vld [vmem:[%s4911_s5 + $0xf0] sm:$0xff]  ;;  %v2975_v23 = vrot.slane %v4674_v52, %v1450_v11  ;;  %v3454_v11 = vld [vmem:[%s4911_s5 + $0x100] sm:$0xff] }
0x1298   :  { %v4076_v58 = vpack.c.bf16 %v3453_v15, %v3452_v14 }
0x1299   :  { %v2754_v24 = vmul.f32 1.442695, %v2752_v25 }
0x129a   :  { %v2751_v26 = vpop.xlane.xlu1 %2750 }
0x129b   :  { %v2753_v22 = vsub.f32 %v2745_v21, %v2751_v26 }
0x129d   :  { %v2756_v27 = vmul.f32 1.442695, %v2753_v22  ;;  %v2981_v22 = vrot.slane %v4674_v52, %v1456_v12  ;;  %v3456_v12 = vld [vmem:[%s4911_s5 + $0x110] sm:$0xff] }
0x129f   :  { %4287 = vpow2.f32 %v2756_v27 }
0x12a0   :  { %4289 = vpow2.f32 %v2754_v24 }
0x12a9   :  { %v4288_v28 = vpop.eup %4287 }
0x12aa   :  { %v2761_v29 = vsel %vm364_vm4, %v4288_v28, 0.0  ;;  %v4290_v30 = vpop.eup %4289 }
0x12ab   :  { %2762 = vadd.xlane.f32.xlu1 %v2761_v29  ;;  %v2758_v31 = vsel %vm364_vm4, %v4290_v30, 0.0 }
0x12af   :  { %2759 = vadd.xlane.f32.xlu1 %v2758_v31 }
0x12c0   :  { %4211 = vrot.lane.b32.xlu1 %v4687_v0, %s4323_s9 }
0x12df   :  { %v3859_v32 = vpop.f32.mrb[20].mxu0 }
0x12e0   :  { %v2559_v63 = vpop.f32.mrb[21].mxu0 }
0x12e1   :  { %3862 = vmatprep.mubr.msk.f32.mxu0 %vm276_vm2, %v2559_v63 }
0x12e2   :  { %3863 = vmatmul.mubr.msk.f32.vlgmr.msra.gmra.mrb[18].mxu0 %vm276_vm2, %v3859_v32  ;;  %v3455_v32 = vld [vmem:[%s4911_s5 + $0x108] sm:$0xff] }
0x12e3   :  { %v4080_v63 = vpack.c.bf16 %v3455_v32, %v3454_v11 }
0x1338   :  { %v2763_v33 = vpop.xlane.xlu1 %2762 }
0x1339   :  { %4291 = vrcp.f32 %v2763_v33  ;;  %v3457_v33 = vld [vmem:[%s4911_s5 + $0x118] sm:$0xff] }
0x133c   :  { %v2760_v34 = vpop.xlane.xlu1 %2759 }
0x133d   :  { %4293 = vrcp.f32 %v2760_v34  ;;  %v3458_v34 = vld [vmem:[%s4911_s5 + $0x120] sm:$0xff] }
0x1340   :  { %v4212_v35 = vpop.permute.xlu1 %4211 }
0x1341   :  { %v4214_v37 = vunpack.i.h.bf16 %v4212_v35  ;;  %v4213_v41 = vunpack.i.l.bf16 %v4212_v35  ;;  %v4084_v35 = vpack.c.bf16 %v3457_v33, %v3456_v12 }
0x1343   :  { %v4068_v42 = vpack.c.bf16 %v4214_v37, %v4213_v41  ;;  %v4292_v0 = vpop.eup %4291  ;;  %v3459_v37 = vld [vmem:[%s4911_s5 + $0x128] sm:$0xff] }
0x1344   :  { %v2767_v46 = vmul.f32 %v4292_v0, %v4288_v28  ;;  %v4088_v41 = vpack.c.bf16 %v3459_v37, %v3458_v34 }
0x1345   :  { %4069 = vmatprep.subr.bf16.mxu0 %v4068_v42 }
0x1346   :  { %4071 = vmatpush3.bf16.msra.mxu0 %v4068_v42  ;;  %v3460_v42 = vld [vmem:[%s4911_s5 + $0x130] sm:$0xff] }
0x1347   :  { %v4294_v44 = vpop.eup %4293  ;;  %3879 = vmatprep.subr.mxu0 %v3449_v43 }
0x1348   :  { %v2766_v45 = vmul.f32 %v4294_v44, %v4290_v30  ;;  %v2987_v44 = vrot.slane %v4674_v52, %v1462_v36 }
0x134a   :  { %3876 = vmatprep.mubr.msk.f32.mxu0 %vm364_vm4, %v2766_v45 }
0x134b   :  { %3877 = vmatmul.mubr.msk.f32.vlgmr.msra.gmra.mrb[22].mxu0 %vm364_vm4, %v2767_v46 }
0x134c   :  { %3880 = vmatpush3.msra.mxu0 %v3449_v43  ;;  %v3461_v43 = vld [vmem:[%s4911_s5 + $0x138] sm:$0xff] }
0x134d   :  { %4081 = vmatprep.subr.bf16.mxu0 %v4080_v63  ;;  %v4092_v0 = vpack.c.bf16 %v3461_v43, %v3460_v42  ;;  %v3209_v42 = vrot.slane %v4674_v52, %v1684_v40  ;;  %v3306_v40 = vld [vmem:[%s4914_s4 + $0x10] sm:$0xff] }
0x141e   :  { %v3878_v47 = vpop.f32.mrb[22].mxu0 }
0x141f   :  { %v2846_v49 = vpop.f32.mrb[23].mxu0 }
0x1420   :  { %3881 = vmatprep.mubr.msk.f32.mxu0 %vm276_vm2, %v2846_v49 }
0x1421   :  { %3882 = vmatmul.mubr.msk.f32.vlgmr.msra.gmra.mrb[18].mxu0 %vm276_vm2, %v3878_v47 }
0x1422   :  { %4083 = vmatpush3.bf16.msra.mxu0 %v4080_v63 }
0x1423   :  { %4085 = vmatprep.subr.bf16.mxu0 %v4084_v35 }
0x1426   :  { %4087 = vmatpush3.bf16.msra.mxu0 %v4084_v35  ;;  %v3203_v35 = vrot.slane %v4674_v52, %v1678_v39  ;;  %v3304_v39 = vld [vmem:[%s4914_s4] sm:$0xff] }
0x1427   :  { %4089 = vmatprep.subr.bf16.mxu0 %v4088_v41 }
0x142a   :  { %4091 = vmatpush3.bf16.msra.mxu0 %v4088_v41 }
0x142b   :  { %4093 = vmatprep.subr.bf16.mxu0 %v4092_v0 }
0x142e   :  { %4095 = vmatpush3.bf16.msra.mxu0 %v4092_v0 }
0x14f4   :  { %v3883_v57 = vpop.f32.mrb[18].mxu0 }
0x14f5   :  { %v2943_v54 = vadd.f32 %v3883_v57, %v2941_v6  ;;  %v2927_v59 = vpop.f32.mrb[19].mxu0 }
0x14f6   :  { %v2942_v56 = vadd.f32 %v2941_v6, %v2927_v59 }
0x14f7   :  { %v2945_v53 = vadd.f32 %v2943_v54, %v4667_v50 }
0x14f8   :  { %v2944_v51 = vadd.f32 %v2942_v56, %v4663_v48  ;;  %v3450_v48 = vld [vmem:[%s4911_s5 + $0xe0] sm:$0xff] }
0x14f9   :  { %v2949_v1 = vsel %vm122_vm1, %v2945_v53, 0.0  ;;  %v4072_v61 = vpack.c.bf16 %v3451_v13, %v3450_v48 }
0x14fa   :  { %2950 = vadd.xlane.f32.xlu1 %v2949_v1  ;;  %v2946_v2 = vsel %vm122_vm1, %v2944_v51, 0.0 }
0x14fb   :  { %2947 = vadd.xlane.f32.xlu0 %v2946_v2  ;;  %4073 = vmatprep.subr.bf16.mxu1 %v4072_v61 }
0x14fc   :  { %4075 = vmatpush3.bf16.msra.mxu1 %v4072_v61 }
0x14fd   :  { %4077 = vmatprep.subr.bf16.mxu1 %v4076_v58 }
0x1500   :  { %4079 = vmatpush3.bf16.msra.mxu1 %v4076_v58 }
0x1587   :  { %v2951_v4 = vpop.xlane.xlu1 %2950 }
0x1588   :  { %v2953_v5 = vmul.f32 0.03125, %v2951_v4  ;;  %v2948_v7 = vpop.xlane.xlu0 %2947 }
0x1589   :  { %v2952_v62 = vmul.f32 0.03125, %v2948_v7 }
0x158a   :  { %v2955_v8 = vsub.f32 %v2945_v53, %v2953_v5 }
0x158b   :  { %v2954_v38 = vsub.f32 %v2944_v51, %v2952_v62 }
0x158c   :  { %v2957_v60 = vmul.f32 %v2955_v8, %v2955_v8 }
0x158d   :  { %v2956_v9 = vmul.f32 %v2954_v38, %v2954_v38 }
0x158e   :  { %v2961_v50 = vsel %vm122_vm1, %v2957_v60, 0.0  ;;  %v3090_v60 = vrot.slane %v4674_v52, %v1565_v3  ;;  %v4104_v52 = vpack.c.bf16 %v3305_v55, %v3304_v39 }
0x158f   :  { %v2958_v10 = vsel %vm122_vm1, %v2956_v9, 0.0 }
0x1590   :  { %2959 = vadd.xlane.f32.xlu0 %v2958_v10 }
0x1594   :  { %2962 = vadd.xlane.f32.xlu0 %v2961_v50 }
0x161d   :  { %v2960_v16 = vpop.xlane.xlu0 %2959 }
0x161e   :  { %v2964_v17 = vmul.f32 0.03125, %v2960_v16 }
0x1620   :  { %v2966_v21 = vadd.f32 1e-12, %v2964_v17 }
0x1621   :  { %v2963_v19 = vpop.xlane.xlu0 %2962 }
0x1622   :  { %4295 = vrsqrt.f32 %v2966_v21  ;;  %v2965_v20 = vmul.f32 0.03125, %v2963_v19 }
0x1624   :  { %v2967_v18 = vadd.f32 1e-12, %v2965_v20 }
0x1626   :  { %4297 = vrsqrt.f32 %v2967_v18 }
0x162c   :  { %v4296_v25 = vpop.eup %4295 }
0x162d   :  { %v2970_v26 = vmul.f32 %v4296_v25, %v2954_v38 }
0x162f   :  { %v2976_v24 = vmul.f32 %v2975_v23, %v2970_v26 }
0x1630   :  { %v4298_v27 = vpop.eup %4297 }
0x1631   :  { %v2971_v28 = vmul.f32 %v4298_v27, %v2955_v8  ;;  %v2982_v29 = vadd.f32 %v2981_v22, %v2976_v24  ;;  %v3212_v24 = vld [vmem:[%s4908_s3 + $0x42] sm:$0xff]  ;;  %v3213_v27 = vld [vmem:[%s4908_s3 + $0x4a] sm:$0xff] }
0x1633   :  { %v2977_v30 = vmul.f32 %v2975_v23, %v2971_v28  ;;  %3892 = vmatprep.mubr.msk.f32.mxu1 %vm122_vm1, %v2982_v29  ;;  %v4096_v28 = vpack.c.bf16 %v3213_v27, %v3212_v24 }
0x1635   :  { %v2983_v31 = vadd.f32 %v2981_v22, %v2977_v30  ;;  %4097 = vmatprep.subr.bf16.mxu1 %v4096_v28  ;;  %v3215_v30 = vld [vmem:[%s4908_s3 + $0x5a] sm:$0xff] }
0x1637   :  { %3893 = vmatmul.mubr.msk.f32.vlgmr.msra.gmra.mrb[22].mxu1 %vm122_vm1, %v2983_v31 }
0x1638   :  { %4099 = vmatpush3.bf16.msra.mxu1 %v4096_v28 }
0x170a   :  { %v3894_v45 = vpop.f32.mrb[22].mxu1 }
0x170b   :  { %v3066_v46 = vadd.f32 %v3894_v45, %v2987_v44  ;;  %v3060_v47 = vpop.f32.mrb[23].mxu1 }
0x170c   :  { %v3061_v49 = vadd.f32 %v3060_v47, %v2987_v44 }
0x170d   :  { %v3072_v6 = vmul.f32 0.044715, %v3066_v46  ;;  %v3070_v38 = vmul.f32 0.5, %v3066_v46 }
0x170e   :  { %v3071_v57 = vmul.f32 0.044715, %v3061_v49  ;;  %v3069_v36 = vmul.f32 0.5, %v3061_v49 }
0x170f   :  { %v3074_v54 = vmul.f32 %v3072_v6, %v3066_v46 }
0x1710   :  { %v3073_v59 = vmul.f32 %v3071_v57, %v3061_v49  ;;  %v3501_v57 = vld [vmem:[%s4908_s3 + $0x62] ss:$0 sm:$0xff] }
0x1711   :  { %v3076_v56 = vmul.f32 %v3074_v54, %v3066_v46 }
0x1712   :  { %v3075_v53 = vmul.f32 %v3073_v59, %v3061_v49 }
0x1713   :  { %v3078_v51 = vadd.f32 %v3076_v56, %v3066_v46 }
0x1714   :  { %v3077_v1 = vadd.f32 %v3075_v53, %v3061_v49  ;;  %v3307_v49 = vld [vmem:[%s4914_s4 + $0x18] sm:$0xff] }
0x1715   :  { %v3080_v2 = vmul.f32 0.7978846, %v3078_v51  ;;  %v4108_v6 = vpack.c.bf16 %v3307_v49, %v3306_v40 }
0x1716   :  { %v3079_v4 = vmul.f32 0.7978846, %v3077_v1 }
0x1717   :  { %4299 = vtanh.f32 %v3080_v2  ;;  %v3504_v2 = vld [vmem:[%s4914_s4 + $0x20] ss:$0 sm:$0xff] }
0x1718   :  { %4301 = vtanh.f32 %v3079_v4 }
0x1721   :  { %v4300_v5 = vpop.eup %4299 }
0x1722   :  { %v4302_v7 = vpop.eup %4301  ;;  %v3084_v62 = vadd.f32 1.0, %v4300_v5 }
0x1723   :  { %v3083_v8 = vadd.f32 1.0, %v4302_v7 }
0x1724   :  { %v3086_v10 = vmul.f32 %v3084_v62, %v3070_v38 }
0x1725   :  { %v3085_v9 = vmul.f32 %v3083_v8, %v3069_v36 }
0x1727   :  { %3911 = vmatprep.mubr.msk.f32.mxu0 %vm38_vm0, %v3085_v9 }
0x1728   :  { %3912 = vmatmul.mubr.msk.f32.vlgmr.msra.gmra.mrb[24].mxu0 %vm38_vm0, %v3086_v10 }
0x17fb   :  { %v3913_v50 = vpop.f32.mrb[24].mxu0 }
0x17fc   :  { %v3163_v48 = vpop.f32.mrb[25].mxu0  ;;  %v3169_v13 = vadd.f32 %v3913_v50, %v3090_v60 }
0x17fd   :  { %v3164_v61 = vadd.f32 %v3163_v48, %v3090_v60 }
0x17fe   :  { %v3173_v58 = vadd.f32 %v3169_v13, %v2983_v31 }
0x17ff   :  { %v3172_v14 = vadd.f32 %v3164_v61, %v2982_v29  ;;  %v3214_v29 = vld [vmem:[%s4908_s3 + $0x52] sm:$0xff] }
0x1800   :  { %v3177_v16 = vsel %vm122_vm1, %v3173_v58, 0.0  ;;  %v4100_v31 = vpack.c.bf16 %v3215_v30, %v3214_v29 }
0x1801   :  { %v3174_v15 = vsel %vm122_vm1, %v3172_v14, 0.0 }
0x1802   :  { %3175 = vadd.xlane.f32.xlu0 %v3174_v15  ;;  %4101 = vmatprep.subr.bf16.mxu1 %v4100_v31 }
0x1803   :  { %4103 = vmatpush3.bf16.msra.mxu1 %v4100_v31 }
0x1804   :  { %4105 = vmatprep.subr.bf16.mxu1 %v4104_v52 }
0x1806   :  { %3178 = vadd.xlane.f32.xlu0 %v3177_v16 }
0x188f   :  { %v3176_v17 = vpop.xlane.xlu0 %3175 }
0x1890   :  { %v3180_v21 = vmul.f32 0.03125, %v3176_v17 }
0x1892   :  { %v3182_v19 = vsub.f32 %v3172_v14, %v3180_v21 }
0x1893   :  { %v3179_v20 = vpop.xlane.xlu0 %3178 }
0x1894   :  { %v3181_v18 = vmul.f32 0.03125, %v3179_v20  ;;  %v3184_v23 = vmul.f32 %v3182_v19, %v3182_v19 }
0x1896   :  { %v3183_v25 = vsub.f32 %v3173_v58, %v3181_v18  ;;  %v3186_v3 = vsel %vm122_vm1, %v3184_v23, 0.0 }
0x1897   :  { %3187 = vadd.xlane.f32.xlu0 %v3186_v3 }
0x1898   :  { %v3185_v26 = vmul.f32 %v3183_v25, %v3183_v25 }
0x189a   :  { %v3189_v22 = vsel %vm122_vm1, %v3185_v26, 0.0 }
0x189b   :  { %3190 = vadd.xlane.f32.xlu1 %v3189_v22 }
0x1924   :  { %v3188_v11 = vpop.xlane.xlu0 %3187 }
0x1925   :  { %v3192_v32 = vmul.f32 0.03125, %v3188_v11 }
0x1927   :  { %v3194_v63 = vadd.f32 1e-12, %v3192_v32 }
0x1928   :  { %v3191_v12 = vpop.xlane.xlu1 %3190 }
0x1929   :  { %4303 = vrsqrt.f32 %v3194_v63  ;;  %v3193_v33 = vmul.f32 0.03125, %v3191_v12 }
0x192b   :  { %v3195_v34 = vadd.f32 1e-12, %v3193_v33 }
0x192d   :  { %4305 = vrsqrt.f32 %v3195_v34 }
0x1933   :  { %v4304_v37 = vpop.eup %4303 }
0x1934   :  { %v3198_v41 = vmul.f32 %v4304_v37, %v3182_v19 }
0x1936   :  { %v3204_v43 = vmul.f32 %v3203_v35, %v3198_v41 }
0x1937   :  { %v4306_v0 = vpop.eup %4305 }
0x1938   :  { %v3199_v44 = vmul.f32 %v4306_v0, %v3183_v25  ;;  %v3210_v45 = vadd.f32 %v3209_v42, %v3204_v43 }
0x193a   :  { %v3205_v46 = vmul.f32 %v3203_v35, %v3199_v44  ;;  %3922 = vmatprep.mubr.msk.f32.mxu1 %vm122_vm1, %v3210_v45 }
0x193c   :  { %v3211_v47 = vadd.f32 %v3209_v42, %v3205_v46 }
0x193e   :  { %3923 = vmatmul.mubr.msk.f32.vlgmr.msra.gmra.mrb[24].mxu1 %vm122_vm1, %v3211_v47 }
0x193f   :  { %4107 = vmatpush3.bf16.msra.mxu1 %v4104_v52 }
0x1940   :  { %4109 = vmatprep.subr.bf16.mxu1 %v4108_v6 }
0x1943   :  { %4111 = vmatpush3.bf16.msra.mxu1 %v4108_v6 }
0x1a11   :  { %v3924_v54 = vpop.f32.mrb[24].mxu1 }
0x1a12   :  { %v3299_v59 = vadd.f32 %v3924_v54, %v3501_v57  ;;  %v3293_v56 = vpop.f32.mrb[25].mxu1 }
0x1a13   :  { %v3294_v53 = vadd.f32 %v3501_v57, %v3293_v56 }
0x1a15   :  { %4307 = vtanh.f32 %v3294_v53 }
0x1a16   :  { %4309 = vtanh.f32 %v3299_v59 }
0x1a1f   :  { %v4308_v51 = vpop.eup %4307 }
0x1a20   :  { %v4310_v1 = vpop.eup %4309  ;;  %3933 = vmatprep.mubr.msk.f32.mxu1 %vm122_vm1, %v4308_v51 }
0x1a21   :  { %3934 = vmatmul.mubr.msk.f32.vlgmr.msra.gmra.mrb[26].mxu1 %vm122_vm1, %v4310_v1 }
0x1af4   :  { %v3935_v4 = vpop.f32.mrb[26].mxu1 }
0x1af5   :  { %v3391_v5 = vadd.f32 %v3935_v4, %v3504_v2  ;;  %v3385_v7 = vpop.f32.mrb[27].mxu1 }
0x1af6   :  { %v3386_v62 = vadd.f32 %v3504_v2, %v3385_v7 }
0x1af7   :  { %3395 = vst [vmem:[%s4915_s7 + $0x8] sm:$0xff] %v3391_v5 }
0x1af8   :  { %3394 = vst [vmem:[%s4915_s7] sm:$0xff] %v3386_v62 }

</bundles_post_ra>
